<compile_context>
chip_gen: v7x
topology: tpu7x:2x2x1
jax: 0.10.0
libtpu: 0.0.40
codegen_flags: <defaults>
</compile_context>

<pallas_src>
import functools

import jax
import jax.numpy as jnp
from jax.experimental import pallas as pl
from jax.experimental.pallas import tpu as pltpu


def _nbytes(a):
    return int(a.size) * a.dtype.itemsize


def _dot_nt(a, b):
    """a [m, c] · b[n, c]^T -> [m, n] (f32 accumulate)."""
    return jax.lax.dot_general(a, b, (((1,), (1,)), ((), ())),
                               preferred_element_type=jnp.float32)


# ----------------------------------------------------------------------------
# Kernel 1: fused relative-position decoder stack
# ----------------------------------------------------------------------------
def _tg_stack_kernel(
    emb_ref,        # [qlen, dm]    bf16  word embeddings of batch b
    mask_ref,       # [qlen, klen]  int32 (1 = visible)
    pos_ref,        # [rlen, dm]    f32   sinusoidal positional embedding
    rwbT_ref,       # [H, H*D]      f32   block-diag(r_w_bias)^T
    rrbT_ref,       # [H, H*D]      f32   block-diag(r_r_bias)^T
    rnet_ref,       # [dm, H*D]     bf16  per-layer r_net weight
    qkv_ref,        # [dm, 3*H*D]   bf16
    o_ref,          # [H*D, dm]     bf16
    ln1g_ref, ln1b_ref,          # [1, dm]  f32
    ff1w_ref, ff1b_ref,          # [dm, di] bf16 / [1, di] f32
    ff2w_ref, ff2b_ref,          # [di, dm] bf16 / [1, dm] f32
    ln2g_ref, ln2b_ref,          # [1, dm]  f32
    core_ref,                    # [qlen, dm] f32 — output / resident residual
    av_sc,                       # [qlen, H*D] f32 — per-head attention outputs
    *, n_head, d_head,
):
    l = pl.program_id(1)

    @pl.when(l == 0)
    def _():
        core_ref[...] = emb_ref[...].astype(jnp.float32)

    hd = n_head * d_head
    scale = 1.0 / (d_head ** 0.5)
    bf16 = jnp.bfloat16

    w = core_ref[...]                                   # [q, dm] f32
    mask = mask_ref[...] > 0                            # [q, k]  bool

    # per-layer relative-position keys: r_head_k = r_net(pos_emb)  [k, H*D]
    rk = jnp.dot(pos_ref[...].astype(bf16), rnet_ref[...],
                 preferred_element_type=jnp.float32)

    # fused qkv projection — one MXU matmul for all heads (bias-free Linear)
    w_heads = jnp.dot(w.astype(bf16), qkv_ref[...],
                      preferred_element_type=jnp.float32)        # [q, 3*H*D]
    q_all = w_heads[:, :hd]
    k_all = w_heads[:, hd:2 * hd]
    v_all = w_heads[:, 2 * hd:]

    # AC + BD = q·(k + r_k) + r_w_bias·k + r_r_bias·r_k
    kk = k_all + rk                                              # [k, H*D]
    bias_hk = _dot_nt(rwbT_ref[...], k_all) + _dot_nt(rrbT_ref[...], rk)  # [H, k]

    for h in range(n_head):                     # 2 small matmuls per head
        sl = slice(h * d_head, (h + 1) * d_head)
        s = _dot_nt(q_all[:, sl], kk[:, sl])                     # [q, k]
        s = (s + bias_hk[h:h + 1, :]) * scale
        s = jnp.where(mask, s, -1e30)                 # masked_fill(~mask, -inf)
        s = s - jnp.max(s, axis=-1, keepdims=True)
        p = jnp.exp(s)
        p = p * pl.reciprocal(jnp.sum(p, axis=-1, keepdims=True), approx=True)
        av_sc[:, sl] = jnp.dot(p, v_all[:, sl],
                               preferred_element_type=jnp.float32)

    # single output projection over the concatenated heads (o_net, no bias)
    attn_out = jnp.dot(av_sc[...].astype(bf16), o_ref[...],
                       preferred_element_type=jnp.float32)       # [q, dm]

    # post-layernorm attention residual (pre_lnorm=False)
    x = w + attn_out
    mu = jnp.mean(x, axis=-1, keepdims=True)
    var = jnp.mean((x - mu) ** 2, axis=-1, keepdims=True)
    x = (x - mu) * jax.lax.rsqrt(var + 1e-5) * ln1g_ref[...] + ln1b_ref[...]

    # PositionwiseFF (post-layernorm)
    h1 = jnp.maximum(
        jnp.dot(x.astype(bf16), ff1w_ref[...],
                preferred_element_type=jnp.float32) + ff1b_ref[...], 0.0)
    h2 = (jnp.dot(h1.astype(bf16), ff2w_ref[...],
                  preferred_element_type=jnp.float32) + ff2b_ref[...])
    y = x + h2
    mu = jnp.mean(y, axis=-1, keepdims=True)
    var = jnp.mean((y - mu) ** 2, axis=-1, keepdims=True)
    core_ref[...] = (y - mu) * jax.lax.rsqrt(var + 1e-5) * ln2g_ref[...] + ln2b_ref[...]


def _block_diag_T(bias):
    """[H, D] -> [H, H*D] with row h holding bias[h] at columns h*D:(h+1)*D."""
    n_head, d_head = bias.shape
    eye = jnp.eye(n_head, dtype=bias.dtype)
    return (eye[:, :, None] * bias[None, :, :]).reshape(n_head, n_head * d_head)


def forward_tg(params, inp, attn_mask, *, n_head, d_head):
    """inp: [bsz, qlen] int32 token ids; attn_mask: [bsz, qlen, qlen] int32."""
    bsz, qlen = inp.shape
    vocab, dm = params["emb_att"].shape
    hd = n_head * d_head
    num_layers = params["qkv_w"].shape[0]
    d_inner = params["ff1_w"].shape[-1]

    # embedding lookup + sinusoidal positional encoding (XLA glue, tiny)
    word_emb = params["emb_att"][inp]                              # [b,q,dm] bf16
    pos_seq = jnp.arange(0, qlen, dtype=jnp.float32)
    sinus = pos_seq[:, None] * params["inv_freq"][None, :]
    pos_emb = jnp.concatenate([jnp.sin(sinus), jnp.cos(sinus)], axis=-1)  # [q,dm]

    rwbT = _block_diag_T(params["r_w_bias"])                        # [H, H*D]
    rrbT = _block_diag_T(params["r_r_bias"])

    def batch_spec(shape):
        n = len(shape)
        return pl.BlockSpec((None,) + tuple(shape[1:]),
                            lambda b, l, _n=n: (b,) + (0,) * (_n - 1))

    def layer_spec(shape):
        n = len(shape)
        return pl.BlockSpec((None,) + tuple(shape[1:]),
                            lambda b, l, _n=n: (l,) + (0,) * (_n - 1))

    def const_spec(shape):
        n = len(shape)
        return pl.BlockSpec(tuple(shape), lambda b, l, _n=n: (0,) * _n)

    in_arrays = [
        word_emb, attn_mask, pos_emb, rwbT, rrbT,
        params["r_net_w"], params["qkv_w"], params["o_w"],
        params["ln1_g"], params["ln1_b"],
        params["ff1_w"], params["ff1_b"], params["ff2_w"], params["ff2_b"],
        params["ln2_g"], params["ln2_b"],
    ]
    in_specs = [
        batch_spec(word_emb.shape), batch_spec(attn_mask.shape),
        const_spec(pos_emb.shape), const_spec(rwbT.shape), const_spec(rrbT.shape),
    ] + [layer_spec(a.shape) for a in in_arrays[5:]]

    # advisory cost estimate for XLA's scheduler
    flops_bl = (2 * qlen * dm * hd + 2 * qlen * dm * 3 * hd
                + 4 * n_head * hd * qlen + 4 * qlen * qlen * hd
                + 2 * qlen * hd * dm + 4 * qlen * dm * d_inner)
    layer_bytes = sum(_nbytes(a) for a in in_arrays[5:])
    cost = pl.CostEstimate(
        flops=int(bsz * num_layers * flops_bl),
        transcendentals=int(bsz * num_layers * (qlen * qlen * n_head + 2 * qlen)),
        bytes_accessed=int(_nbytes(word_emb) + _nbytes(attn_mask)
                           + _nbytes(pos_emb) + bsz * layer_bytes
                           + bsz * qlen * dm * 4),
    )

    kernel = functools.partial(_tg_stack_kernel, n_head=n_head, d_head=d_head)
    # TODO(synk): for v7x (2 TensorCores) with tiny bsz, add a second parallel
    #             grid axis (qlen tiles) and set vmem_limit_bytes explicitly.
    return pl.pallas_call(
        kernel,
        out_shape=jax.ShapeDtypeStruct((bsz, qlen, dm), jnp.float32),
        grid=(bsz, num_layers),
        in_specs=in_specs,
        out_specs=batch_spec((bsz, qlen, dm)),
        scratch_shapes=[pltpu.VMEM((qlen, hd), jnp.float32)],
        compiler_params=pltpu.CompilerParams(
            dimension_semantics=("parallel", "arbitrary")),
        cost_estimate=cost,
    )(*in_arrays)


# ----------------------------------------------------------------------------
# Kernel 2: tied projection + log-softmax + weighted cross-entropy (fused)
#   grid = (batch, vocab_tile); online logsumexp across vocab tiles; only the
#   per-token weighted log-prob is written to HBM (logits never leave VMEM).
# ----------------------------------------------------------------------------
def _proj_ce_kernel(hid_ref,    # [qlen, dm]   f32
                    emb_ref,    # [tv, dm]     bf16  (tied projection weight tile)
                    bias_ref,   # [1, tv]      f32
                    tgt_ref,    # [qlen, 1]    int32
                    wt_ref,     # [qlen, 1]    f32   (class weight, 0 for pad)
                    out_ref,    # [qlen, 1]    f32
                    m_sc, l_sc, t_sc,          # [qlen, 1] f32 scratch
                    *, tile_v):
    vt = pl.program_id(1)
    nv = pl.num_programs(1)

    @pl.when(vt == 0)
    def _():
        m_sc[...] = jnp.full(m_sc.shape, -1e30, jnp.float32)
        l_sc[...] = jnp.zeros(l_sc.shape, jnp.float32)
        t_sc[...] = jnp.zeros(t_sc.shape, jnp.float32)

    # logits tile: hidden @ emb_tile^T + bias   (contracts emb dim 1, no host .T)
    logits = _dot_nt(hid_ref[...].astype(jnp.bfloat16), emb_ref[...])
    logits = logits + bias_ref[...]                              # [q, tv]

    m_prev = m_sc[...]
    m_new = jnp.maximum(m_prev, jnp.max(logits, axis=-1, keepdims=True))
    l_sc[...] = (l_sc[...] * jnp.exp(m_prev - m_new)
                 + jnp.sum(jnp.exp(logits - m_new), axis=-1, keepdims=True))
    m_sc[...] = m_new

    # pick the target logit via one-hot (ignore_index handled by wt == 0)
    col = jax.lax.broadcasted_iota(jnp.int32, logits.shape, 1) + vt * tile_v
    hit = col == tgt_ref[...]
    t_sc[...] += jnp.sum(jnp.where(hit, logits, 0.0), axis=-1, keepdims=True)

    @pl.when(vt == nv - 1)
    def _():
        logp = t_sc[...] - (m_sc[...] + jnp.log(l_sc[...]))
        out_ref[...] = wt_ref[...] * logp


def fused_logp_ce(hidden, emb_att, proj_b, tgt, wt, *, tile_v=None):
    """Returns per-token weighted log-prob [bsz, qlen]  (== -CE, reduction='none')."""
    bsz, qlen, dm = hidden.shape
    vocab = emb_att.shape[0]
    tv = vocab if tile_v is None else tile_v
    assert vocab % tv == 0
    nv = vocab // tv

    tgt3 = tgt.astype(jnp.int32)[..., None]
    wt3 = wt.astype(jnp.float32)[..., None]

    cost = pl.CostEstimate(
        flops=int(2 * bsz * qlen * dm * vocab),
        transcendentals=int(bsz * qlen * vocab),
        bytes_accessed=int(_nbytes(hidden) + bsz * _nbytes(emb_att)
                           + _nbytes(tgt3) + _nbytes(wt3) + bsz * qlen * 4),
    )
    kernel = functools.partial(_proj_ce_kernel, tile_v=tv)
    out = pl.pallas_call(
        kernel,
        out_shape=jax.ShapeDtypeStruct((bsz, qlen, 1), jnp.float32),
        grid=(bsz, nv),
        in_specs=[
            pl.BlockSpec((None, qlen, dm), lambda b, v: (b, 0, 0)),
            pl.BlockSpec((tv, dm), lambda b, v: (v, 0)),
            pl.BlockSpec((1, tv), lambda b, v: (0, v)),
            pl.BlockSpec((None, qlen, 1), lambda b, v: (b, 0, 0)),
            pl.BlockSpec((None, qlen, 1), lambda b, v: (b, 0, 0)),
        ],
        out_specs=pl.BlockSpec((None, qlen, 1), lambda b, v: (b, 0, 0)),
        scratch_shapes=[pltpu.VMEM((qlen, 1), jnp.float32)] * 3,
        compiler_params=pltpu.CompilerParams(
            dimension_semantics=("parallel", "arbitrary")),
        cost_estimate=cost,
    )(hidden, emb_att, proj_b, tgt3, wt3)
    return out[..., 0]


# ----------------------------------------------------------------------------
# Parameters
# ----------------------------------------------------------------------------
def init_params(key, *, vocab, d_model, n_head, d_head, d_inner, num_layers):
    hd = n_head * d_head
    ks = jax.random.split(key, 12)
    bf = jnp.bfloat16

    def nrm(k, s, dtype=jnp.float32):
        return (0.02 * jax.random.normal(k, s)).astype(dtype)

    return {
        # tied embedding / projection weight, kept bf16 for the MXU
        "emb_att": nrm(ks[0], (vocab, d_model), bf),
        "proj_b": nrm(ks[1], (1, vocab)),
        "r_w_bias": nrm(ks[2], (n_head, d_head)),
        "r_r_bias": nrm(ks[3], (n_head, d_head)),
        "inv_freq": (1.0 / (10000.0 ** (jnp.arange(0.0, d_model, 2.0) / d_model))
                     ).astype(jnp.float32),
        # per-layer weights stacked along a leading layer axis (streamed by grid)
        "r_net_w": nrm(ks[4], (num_layers, d_model, hd), bf),
        "qkv_w": nrm(ks[5], (num_layers, d_model, 3 * hd), bf),
        "o_w": nrm(ks[6], (num_layers, hd, d_model), bf),
        "ln1_g": jnp.ones((num_layers, 1, d_model), jnp.float32),
        "ln1_b": jnp.zeros((num_layers, 1, d_model), jnp.float32),
        "ff1_w": nrm(ks[7], (num_layers, d_model, d_inner), bf),
        "ff1_b": nrm(ks[8], (num_layers, 1, d_inner)),
        "ff2_w": nrm(ks[9], (num_layers, d_inner, d_model), bf),
        "ff2_b": nrm(ks[10], (num_layers, 1, d_model)),
        "ln2_g": jnp.ones((num_layers, 1, d_model), jnp.float32),
        "ln2_b": jnp.zeros((num_layers, 1, d_model), jnp.float32),
    }


# ----------------------------------------------------------------------------
# Pure-JAX reference (same bf16 weight matmuls, f32 LN/softmax)
# ----------------------------------------------------------------------------
def ref_forward(params, inp, mask, *, n_head, d_head):
    f32 = jnp.float32
    bsz, qlen = inp.shape
    dm = params["emb_att"].shape[1]
    hd = n_head * d_head
    num_layers = params["qkv_w"].shape[0]

    def bdot(a, w):
        return jnp.dot(a.astype(jnp.bfloat16), w, preferred_element_type=f32)

    pos = jnp.arange(0, qlen, dtype=f32)
    si = pos[:, None] * params["inv_freq"][None, :]
    pe = jnp.concatenate([jnp.sin(si), jnp.cos(si)], -1)
    core = params["emb_att"][inp].astype(f32)
    for li in range(num_layers):
        rk = bdot(pe, params["r_net_w"][li]).reshape(qlen, n_head, d_head)
        wh = bdot(core, params["qkv_w"][li])
        q = wh[..., :hd].reshape(bsz, qlen, n_head, d_head)
        k = wh[..., hd:2 * hd].reshape(bsz, qlen, n_head, d_head)
        v = wh[..., 2 * hd:].reshape(bsz, qlen, n_head, d_head)
        ac = jnp.einsum("bind,bjnd->bijn", q + params["r_w_bias"], k)
        bd = jnp.einsum("bind,jnd->bijn", q + params["r_r_bias"], rk)
        s = (ac + bd) / (d_head ** 0.5)
        s = jnp.where(mask[:, :, :, None] > 0, s, -1e30)
        p = jax.nn.softmax(s, axis=2)
        av = jnp.einsum("bijn,bjnd->bind", p, v).reshape(bsz, qlen, hd)
        x = core + bdot(av, params["o_w"][li])
        mu = x.mean(-1, keepdims=True)
        var = ((x - mu) ** 2).mean(-1, keepdims=True)
        x = (x - mu) * jax.lax.rsqrt(var + 1e-5) * params["ln1_g"][li] + params["ln1_b"][li]
        h1 = jnp.maximum(bdot(x, params["ff1_w"][li]) + params["ff1_b"][li], 0.0)
        h2 = bdot(h1, params["ff2_w"][li]) + params["ff2_b"][li]
        y = x + h2
        mu = y.mean(-1, keepdims=True)
        var = ((y - mu) ** 2).mean(-1, keepdims=True)
        core = (y - mu) * jax.lax.rsqrt(var + 1e-5) * params["ln2_g"][li] + params["ln2_b"][li]
    return core


def ref_logp(params, hidden, tgt, kl_pen):
    vocab = params["emb_att"].shape[0]
    logits = jnp.dot(hidden.astype(jnp.bfloat16), params["emb_att"].T,
                     preferred_element_type=jnp.float32) + params["proj_b"][0]
    logz = jax.nn.log_softmax(logits, axis=-1)
    lp = jnp.take_along_axis(logz, tgt[..., None], axis=-1)[..., 0]
    w_vec = jnp.ones((vocab,), jnp.float32).at[4].set(kl_pen).at[5].set(kl_pen)
    wt = w_vec[tgt] * (tgt != 0).astype(jnp.float32)
    return (wt * lp).sum(axis=1)


# ----------------------------------------------------------------------------
def main():
    vocab, d_model, n_head, d_head, d_inner, num_layers = 64, 32, 4, 8, 64, 2
    batch, seq, samples, kl_pen = 2, 9, 1, 1.0

    key = jax.random.PRNGKey(0)
    pkey, xkey = jax.random.split(key)
    params = init_params(pkey, vocab=vocab, d_model=d_model, n_head=n_head,
                         d_head=d_head, d_inner=d_inner, num_layers=num_layers)

    x = jax.random.randint(xkey, (batch, seq), 3, vocab, dtype=jnp.int32)
    x = x[:, 1:]                                   # matches `x = x[:, 1:]`
    bsz, qlen = x.shape

    # stand-in `inp`, causal attention mask, and next-token labels (see TODO)
    inp = x
    attn_mask = jnp.broadcast_to(
        jnp.tril(jnp.ones((qlen, qlen), jnp.int32)), (bsz, qlen, qlen))
    tgt = jnp.concatenate([inp[:, 1:], jnp.full((bsz, 1), 2, jnp.int32)], axis=1)

    # ---- Pallas path ----
    hidden = forward_tg(params, inp, attn_mask, n_head=n_head, d_head=d_head)
    w_vec = jnp.ones((vocab,), jnp.float32).at[4].set(kl_pen).at[5].set(kl_pen)
    wt = w_vec[tgt] * (tgt != 0).astype(jnp.float32)
    lp_tok = fused_logp_ce(hidden, params["emb_att"], params["proj_b"], tgt, wt)
    log_p = lp_tok.sum(axis=1).reshape(batch, samples)     # CE reduction='none', .sum(1)
    jax.block_until_ready((hidden, log_p))

    # ---- pure-JAX reference check ----
    ref_hidden = ref_forward(params, inp, attn_mask, n_head=n_head, d_head=d_head)
    ref_lp = ref_logp(params, ref_hidden, tgt, kl_pen).reshape(batch, samples)
    assert jnp.allclose(hidden, ref_hidden, rtol=2e-2, atol=2e-2), "hidden mismatch"
    assert jnp.allclose(log_p, ref_lp, rtol=2e-2, atol=1e-1), "log_p mismatch"

    print("KERNEL_OK")


if __name__ == "__main__":
    main()
</pallas_src>

<mosaic_0001>
module attributes {stable_mosaic.version = 11 : i64} {
  func.func @_tg_stack_kernel(%arg0: i32, %arg1: i32, %arg2: memref<1x8x32xbf16, #tpu.memory_space<vmem>>, %arg3: memref<1x8x8xi32, #tpu.memory_space<vmem>>, %arg4: memref<8x32xf32, #tpu.memory_space<vmem>>, %arg5: memref<4x32xf32, #tpu.memory_space<vmem>>, %arg6: memref<4x32xf32, #tpu.memory_space<vmem>>, %arg7: memref<1x32x32xbf16, #tpu.memory_space<vmem>>, %arg8: memref<1x32x96xbf16, #tpu.memory_space<vmem>>, %arg9: memref<1x32x32xbf16, #tpu.memory_space<vmem>>, %arg10: memref<1x1x32xf32, #tpu.memory_space<vmem>>, %arg11: memref<1x1x32xf32, #tpu.memory_space<vmem>>, %arg12: memref<1x32x64xbf16, #tpu.memory_space<vmem>>, %arg13: memref<1x1x64xf32, #tpu.memory_space<vmem>>, %arg14: memref<1x64x32xbf16, #tpu.memory_space<vmem>>, %arg15: memref<1x1x32xf32, #tpu.memory_space<vmem>>, %arg16: memref<1x1x32xf32, #tpu.memory_space<vmem>>, %arg17: memref<1x1x32xf32, #tpu.memory_space<vmem>>, %arg18: memref<1x8x32xf32, #tpu.memory_space<vmem>>, %arg19: memref<8x32xf32, #tpu.memory_space<vmem>>) attributes {dimension_semantics = [#tpu.dimension_semantics<parallel>, #tpu.dimension_semantics<arbitrary>], iteration_bounds = array<i64: 2, 2>, scalar_prefetch = 0 : i64, scratch_operands = 1 : i64, tpu.core_type = #tpu.core_type<tc>, window_params = [{transform_indices = @transform_0, window_bounds = array<i64: 1, 8, 32>}, {transform_indices = @transform_1, window_bounds = array<i64: 1, 8, 8>}, {pipeline_mode = #tpu.pipeline_mode<synchronous>, transform_indices = @transform_2, window_bounds = array<i64: 8, 32>}, {pipeline_mode = #tpu.pipeline_mode<synchronous>, transform_indices = @transform_3, window_bounds = array<i64: 4, 32>}, {pipeline_mode = #tpu.pipeline_mode<synchronous>, transform_indices = @transform_4, window_bounds = array<i64: 4, 32>}, {transform_indices = @transform_5, window_bounds = array<i64: 1, 32, 32>}, {transform_indices = @transform_6, window_bounds = array<i64: 1, 32, 96>}, {transform_indices = @transform_7, window_bounds = array<i64: 1, 32, 32>}, {transform_indices = @transform_8, window_bounds = array<i64: 1, 1, 32>}, {transform_indices = @transform_9, window_bounds = array<i64: 1, 1, 32>}, {transform_indices = @transform_10, window_bounds = array<i64: 1, 32, 64>}, {transform_indices = @transform_11, window_bounds = array<i64: 1, 1, 64>}, {transform_indices = @transform_12, window_bounds = array<i64: 1, 64, 32>}, {transform_indices = @transform_13, window_bounds = array<i64: 1, 1, 32>}, {transform_indices = @transform_14, window_bounds = array<i64: 1, 1, 32>}, {transform_indices = @transform_15, window_bounds = array<i64: 1, 1, 32>}, {transform_indices = @transform_16, window_bounds = array<i64: 1, 8, 32>}]} {
    %c0_i32 = arith.constant 0 : i32
    %0 = arith.cmpi eq, %arg1, %c0_i32 : i32
    %1 = arith.extui %0 : i1 to i32
    %c0_i32_0 = arith.constant 0 : i32
    %2 = arith.cmpi ne, %1, %c0_i32_0 : i32
    scf.if %2 {
      %c0_97 = arith.constant 0 : index
      %c0_98 = arith.constant 0 : index
      %c0_99 = arith.constant 0 : index
      %199 = vector.load %arg2[%c0_97, %c0_98, %c0_99] : memref<1x8x32xbf16, #tpu.memory_space<vmem>>, vector<1x8x32xbf16>
      %200 = vector.shape_cast %199 : vector<1x8x32xbf16> to vector<8x32xbf16>
      %201 = arith.extf %200 : vector<8x32xbf16> to vector<8x32xf32>
      %c0_100 = arith.constant 0 : index
      %c0_101 = arith.constant 0 : index
      %c0_102 = arith.constant 0 : index
      %202 = vector.load %arg18[%c0_100, %c0_101, %c0_102] : memref<1x8x32xf32, #tpu.memory_space<vmem>>, vector<1x8x32xf32>
      %203 = vector.shape_cast %202 : vector<1x8x32xf32> to vector<8x32xf32>
      %204 = vector.shape_cast %201 : vector<8x32xf32> to vector<1x8x32xf32>
      tpu.vector_store %arg18[%c0_100, %c0_101, %c0_102], %204 {strides = array<i32>} : memref<1x8x32xf32, #tpu.memory_space<vmem>>, vector<1x8x32xf32>,
    } else {
    }
    %c0 = arith.constant 0 : index
    %c0_1 = arith.constant 0 : index
    %c0_2 = arith.constant 0 : index
    %3 = vector.load %arg18[%c0, %c0_1, %c0_2] : memref<1x8x32xf32, #tpu.memory_space<vmem>>, vector<1x8x32xf32>
    %4 = vector.shape_cast %3 : vector<1x8x32xf32> to vector<8x32xf32>
    %c0_3 = arith.constant 0 : index
    %c0_4 = arith.constant 0 : index
    %c0_5 = arith.constant 0 : index
    %5 = vector.load %arg3[%c0_3, %c0_4, %c0_5] : memref<1x8x8xi32, #tpu.memory_space<vmem>>, vector<1x8x8xi32>
    %6 = vector.shape_cast %5 : vector<1x8x8xi32> to vector<8x8xi32>
    %c0_i32_6 = arith.constant 0 : i32
    %7 = vector.broadcast %c0_i32_6 : i32 to vector<8x8xi32>
    %8 = arith.cmpi sgt, %6, %7 : vector<8x8xi32>
    %c0_7 = arith.constant 0 : index
    %c0_8 = arith.constant 0 : index
    %9 = vector.load %arg4[%c0_7, %c0_8] : memref<8x32xf32, #tpu.memory_space<vmem>>, vector<8x32xf32>
    %10 = arith.truncf %9 : vector<8x32xf32> to vector<8x32xbf16>
    %c0_9 = arith.constant 0 : index
    %c0_10 = arith.constant 0 : index
    %c0_11 = arith.constant 0 : index
    %11 = vector.load %arg7[%c0_9, %c0_10, %c0_11] : memref<1x32x32xbf16, #tpu.memory_space<vmem>>, vector<1x32x32xbf16>
    %12 = vector.shape_cast %11 : vector<1x32x32xbf16> to vector<32x32xbf16>
    %cst = arith.constant dense<0.000000e+00> : vector<8x32xf32>
    %13 = tpu.matmul %10, %12, %cst {dimension_numbers = #tpu.dot_dimension_numbers<[1], [0], [0], [1], [0, 0, 1, 1], [], []>} : vector<8x32xbf16>, vector<32x32xbf16>, vector<8x32xf32> -> vector<8x32xf32>
    %14 = arith.truncf %4 : vector<8x32xf32> to vector<8x32xbf16>
    %c0_12 = arith.constant 0 : index
    %c0_13 = arith.constant 0 : index
    %c0_14 = arith.constant 0 : index
    %15 = vector.load %arg8[%c0_12, %c0_13, %c0_14] : memref<1x32x96xbf16, #tpu.memory_space<vmem>>, vector<1x32x96xbf16>
    %16 = vector.shape_cast %15 : vector<1x32x96xbf16> to vector<32x96xbf16>
    %cst_15 = arith.constant dense<0.000000e+00> : vector<8x96xf32>
    %17 = tpu.matmul %14, %16, %cst_15 {dimension_numbers = #tpu.dot_dimension_numbers<[1], [0], [0], [1], [0, 0, 1, 1], [], []>} : vector<8x32xbf16>, vector<32x96xbf16>, vector<8x96xf32> -> vector<8x96xf32>
    %18 = vector.extract_strided_slice %17 {offsets = [0, 0], sizes = [8, 32], strides = [1, 1]} : vector<8x96xf32> to vector<8x32xf32>
    %19 = vector.extract_strided_slice %17 {offsets = [0, 32], sizes = [8, 32], strides = [1, 1]} : vector<8x96xf32> to vector<8x32xf32>
    %20 = vector.extract_strided_slice %17 {offsets = [0, 64], sizes = [8, 32], strides = [1, 1]} : vector<8x96xf32> to vector<8x32xf32>
    %21 = arith.addf %19, %13 : vector<8x32xf32>
    %c0_16 = arith.constant 0 : index
    %c0_17 = arith.constant 0 : index
    %22 = vector.load %arg5[%c0_16, %c0_17] : memref<4x32xf32, #tpu.memory_space<vmem>>, vector<4x32xf32>
    %cst_18 = arith.constant dense<0.000000e+00> : vector<4x8xf32>
    %23 = tpu.matmul %22, %19, %cst_18 {dimension_numbers = #tpu.dot_dimension_numbers<[1], [1], [0], [0], [0, 0, 1, 0], [], []>} : vector<4x32xf32>, vector<8x32xf32>, vector<4x8xf32> -> vector<4x8xf32>
    %c0_19 = arith.constant 0 : index
    %c0_20 = arith.constant 0 : index
    %24 = vector.load %arg6[%c0_19, %c0_20] : memref<4x32xf32, #tpu.memory_space<vmem>>, vector<4x32xf32>
    %cst_21 = arith.constant dense<0.000000e+00> : vector<4x8xf32>
    %25 = tpu.matmul %24, %13, %cst_21 {dimension_numbers = #tpu.dot_dimension_numbers<[1], [1], [0], [0], [0, 0, 1, 0], [], []>} : vector<4x32xf32>, vector<8x32xf32>, vector<4x8xf32> -> vector<4x8xf32>
    %26 = arith.addf %23, %25 : vector<4x8xf32>
    %27 = vector.extract_strided_slice %18 {offsets = [0, 0], sizes = [8, 8], strides = [1, 1]} : vector<8x32xf32> to vector<8x8xf32>
    %28 = vector.extract_strided_slice %21 {offsets = [0, 0], sizes = [8, 8], strides = [1, 1]} : vector<8x32xf32> to vector<8x8xf32>
    %cst_22 = arith.constant dense<0.000000e+00> : vector<8x8xf32>
    %29 = tpu.matmul %27, %28, %cst_22 {dimension_numbers = #tpu.dot_dimension_numbers<[1], [1], [0], [0], [0, 0, 1, 0], [], []>} : vector<8x8xf32>, vector<8x8xf32>, vector<8x8xf32> -> vector<8x8xf32>
    %30 = vector.extract_strided_slice %26 {offsets = [0, 0], sizes = [1, 8], strides = [1, 1]} : vector<4x8xf32> to vector<1x8xf32>
    %31 = vector.broadcast %30 : vector<1x8xf32> to vector<8x8xf32>
    %32 = arith.addf %29, %31 : vector<8x8xf32>
    %cst_23 = arith.constant 0.353553385 : f32
    %33 = vector.broadcast %cst_23 : f32 to vector<8x8xf32>
    %34 = arith.mulf %32, %33 : vector<8x8xf32>
    %cst_24 = arith.constant -1.000000e+30 : f32
    %35 = vector.broadcast %cst_24 : f32 to vector<8x8xf32>
    %36 = arith.select %8, %34, %35 : vector<8x8xi1>, vector<8x8xf32>
    %cst_25 = arith.constant dense<0xFF800000> : vector<8xf32>
    %37 = vector.multi_reduction <maximumf>, %36, %cst_25 [1] : vector<8x8xf32> to vector<8xf32>
    %38 = vector.shape_cast %37 : vector<8xf32> to vector<8x1xf32>
    %39 = vector.broadcast %38 : vector<8x1xf32> to vector<8x8xf32>
    %40 = arith.subf %36, %39 : vector<8x8xf32>
    %41 = math.exp %40 : vector<8x8xf32>
    %cst_26 = arith.constant dense<0.000000e+00> : vector<8xf32>
    %42 = vector.multi_reduction <add>, %41, %cst_26 [1] : vector<8x8xf32> to vector<8xf32>
    %43 = vector.shape_cast %42 : vector<8xf32> to vector<8x1xf32>
    %44 = tpu.reciprocal %43 {approx = true} : vector<8x1xf32> -> vector<8x1xf32>
    %45 = vector.broadcast %44 : vector<8x1xf32> to vector<8x8xf32>
    %46 = arith.mulf %41, %45 : vector<8x8xf32>
    %47 = vector.extract_strided_slice %20 {offsets = [0, 0], sizes = [8, 8], strides = [1, 1]} : vector<8x32xf32> to vector<8x8xf32>
    %cst_27 = arith.constant dense<0.000000e+00> : vector<8x8xf32>
    %48 = tpu.matmul %46, %47, %cst_27 {dimension_numbers = #tpu.dot_dimension_numbers<[1], [0], [0], [1], [0, 0, 1, 1], [], []>} : vector<8x8xf32>, vector<8x8xf32>, vector<8x8xf32> -> vector<8x8xf32>
    %c0_28 = arith.constant 0 : index
    %c0_29 = arith.constant 0 : index
    %49 = vector.load %arg19[%c0_28, %c0_29] : memref<8x32xf32, #tpu.memory_space<vmem>>, vector<8x8xf32>
    tpu.vector_store %arg19[%c0_28, %c0_29], %48 {strides = array<i32>} : memref<8x32xf32, #tpu.memory_space<vmem>>, vector<8x8xf32>,
    %50 = vector.extract_strided_slice %18 {offsets = [0, 8], sizes = [8, 8], strides = [1, 1]} : vector<8x32xf32> to vector<8x8xf32>
    %51 = vector.extract_strided_slice %21 {offsets = [0, 8], sizes = [8, 8], strides = [1, 1]} : vector<8x32xf32> to vector<8x8xf32>
    %cst_30 = arith.constant dense<0.000000e+00> : vector<8x8xf32>
    %52 = tpu.matmul %50, %51, %cst_30 {dimension_numbers = #tpu.dot_dimension_numbers<[1], [1], [0], [0], [0, 0, 1, 0], [], []>} : vector<8x8xf32>, vector<8x8xf32>, vector<8x8xf32> -> vector<8x8xf32>
    %53 = vector.extract_strided_slice %26 {offsets = [1, 0], sizes = [1, 8], strides = [1, 1]} : vector<4x8xf32> to vector<1x8xf32>
    %54 = vector.broadcast %53 : vector<1x8xf32> to vector<8x8xf32>
    %55 = arith.addf %52, %54 : vector<8x8xf32>
    %cst_31 = arith.constant 0.353553385 : f32
    %56 = vector.broadcast %cst_31 : f32 to vector<8x8xf32>
    %57 = arith.mulf %55, %56 : vector<8x8xf32>
    %cst_32 = arith.constant -1.000000e+30 : f32
    %58 = vector.broadcast %cst_32 : f32 to vector<8x8xf32>
    %59 = arith.select %8, %57, %58 : vector<8x8xi1>, vector<8x8xf32>
    %cst_33 = arith.constant dense<0xFF800000> : vector<8xf32>
    %60 = vector.multi_reduction <maximumf>, %59, %cst_33 [1] : vector<8x8xf32> to vector<8xf32>
    %61 = vector.shape_cast %60 : vector<8xf32> to vector<8x1xf32>
    %62 = vector.broadcast %61 : vector<8x1xf32> to vector<8x8xf32>
    %63 = arith.subf %59, %62 : vector<8x8xf32>
    %64 = math.exp %63 : vector<8x8xf32>
    %cst_34 = arith.constant dense<0.000000e+00> : vector<8xf32>
    %65 = vector.multi_reduction <add>, %64, %cst_34 [1] : vector<8x8xf32> to vector<8xf32>
    %66 = vector.shape_cast %65 : vector<8xf32> to vector<8x1xf32>
    %67 = tpu.reciprocal %66 {approx = true} : vector<8x1xf32> -> vector<8x1xf32>
    %68 = vector.broadcast %67 : vector<8x1xf32> to vector<8x8xf32>
    %69 = arith.mulf %64, %68 : vector<8x8xf32>
    %70 = vector.extract_strided_slice %20 {offsets = [0, 8], sizes = [8, 8], strides = [1, 1]} : vector<8x32xf32> to vector<8x8xf32>
    %cst_35 = arith.constant dense<0.000000e+00> : vector<8x8xf32>
    %71 = tpu.matmul %69, %70, %cst_35 {dimension_numbers = #tpu.dot_dimension_numbers<[1], [0], [0], [1], [0, 0, 1, 1], [], []>} : vector<8x8xf32>, vector<8x8xf32>, vector<8x8xf32> -> vector<8x8xf32>
    %c0_36 = arith.constant 0 : index
    %c8 = arith.constant 8 : index
    %72 = vector.load %arg19[%c0_36, %c8] : memref<8x32xf32, #tpu.memory_space<vmem>>, vector<8x8xf32>
    tpu.vector_store %arg19[%c0_36, %c8], %71 {strides = array<i32>} : memref<8x32xf32, #tpu.memory_space<vmem>>, vector<8x8xf32>,
    %73 = vector.extract_strided_slice %18 {offsets = [0, 16], sizes = [8, 8], strides = [1, 1]} : vector<8x32xf32> to vector<8x8xf32>
    %74 = vector.extract_strided_slice %21 {offsets = [0, 16], sizes = [8, 8], strides = [1, 1]} : vector<8x32xf32> to vector<8x8xf32>
    %cst_37 = arith.constant dense<0.000000e+00> : vector<8x8xf32>
    %75 = tpu.matmul %73, %74, %cst_37 {dimension_numbers = #tpu.dot_dimension_numbers<[1], [1], [0], [0], [0, 0, 1, 0], [], []>} : vector<8x8xf32>, vector<8x8xf32>, vector<8x8xf32> -> vector<8x8xf32>
    %76 = vector.extract_strided_slice %26 {offsets = [2, 0], sizes = [1, 8], strides = [1, 1]} : vector<4x8xf32> to vector<1x8xf32>
    %77 = vector.broadcast %76 : vector<1x8xf32> to vector<8x8xf32>
    %78 = arith.addf %75, %77 : vector<8x8xf32>
    %cst_38 = arith.constant 0.353553385 : f32
    %79 = vector.broadcast %cst_38 : f32 to vector<8x8xf32>
    %80 = arith.mulf %78, %79 : vector<8x8xf32>
    %cst_39 = arith.constant -1.000000e+30 : f32
    %81 = vector.broadcast %cst_39 : f32 to vector<8x8xf32>
    %82 = arith.select %8, %80, %81 : vector<8x8xi1>, vector<8x8xf32>
    %cst_40 = arith.constant dense<0xFF800000> : vector<8xf32>
    %83 = vector.multi_reduction <maximumf>, %82, %cst_40 [1] : vector<8x8xf32> to vector<8xf32>
    %84 = vector.shape_cast %83 : vector<8xf32> to vector<8x1xf32>
    %85 = vector.broadcast %84 : vector<8x1xf32> to vector<8x8xf32>
    %86 = arith.subf %82, %85 : vector<8x8xf32>
    %87 = math.exp %86 : vector<8x8xf32>
    %cst_41 = arith.constant dense<0.000000e+00> : vector<8xf32>
    %88 = vector.multi_reduction <add>, %87, %cst_41 [1] : vector<8x8xf32> to vector<8xf32>
    %89 = vector.shape_cast %88 : vector<8xf32> to vector<8x1xf32>
    %90 = tpu.reciprocal %89 {approx = true} : vector<8x1xf32> -> vector<8x1xf32>
    %91 = vector.broadcast %90 : vector<8x1xf32> to vector<8x8xf32>
    %92 = arith.mulf %87, %91 : vector<8x8xf32>
    %93 = vector.extract_strided_slice %20 {offsets = [0, 16], sizes = [8, 8], strides = [1, 1]} : vector<8x32xf32> to vector<8x8xf32>
    %cst_42 = arith.constant dense<0.000000e+00> : vector<8x8xf32>
    %94 = tpu.matmul %92, %93, %cst_42 {dimension_numbers = #tpu.dot_dimension_numbers<[1], [0], [0], [1], [0, 0, 1, 1], [], []>} : vector<8x8xf32>, vector<8x8xf32>, vector<8x8xf32> -> vector<8x8xf32>
    %c0_43 = arith.constant 0 : index
    %c16 = arith.constant 16 : index
    %95 = vector.load %arg19[%c0_43, %c16] : memref<8x32xf32, #tpu.memory_space<vmem>>, vector<8x8xf32>
    tpu.vector_store %arg19[%c0_43, %c16], %94 {strides = array<i32>} : memref<8x32xf32, #tpu.memory_space<vmem>>, vector<8x8xf32>,
    %96 = vector.extract_strided_slice %18 {offsets = [0, 24], sizes = [8, 8], strides = [1, 1]} : vector<8x32xf32> to vector<8x8xf32>
    %97 = vector.extract_strided_slice %21 {offsets = [0, 24], sizes = [8, 8], strides = [1, 1]} : vector<8x32xf32> to vector<8x8xf32>
    %cst_44 = arith.constant dense<0.000000e+00> : vector<8x8xf32>
    %98 = tpu.matmul %96, %97, %cst_44 {dimension_numbers = #tpu.dot_dimension_numbers<[1], [1], [0], [0], [0, 0, 1, 0], [], []>} : vector<8x8xf32>, vector<8x8xf32>, vector<8x8xf32> -> vector<8x8xf32>
    %99 = vector.extract_strided_slice %26 {offsets = [3, 0], sizes = [1, 8], strides = [1, 1]} : vector<4x8xf32> to vector<1x8xf32>
    %100 = vector.broadcast %99 : vector<1x8xf32> to vector<8x8xf32>
    %101 = arith.addf %98, %100 : vector<8x8xf32>
    %cst_45 = arith.constant 0.353553385 : f32
    %102 = vector.broadcast %cst_45 : f32 to vector<8x8xf32>
    %103 = arith.mulf %101, %102 : vector<8x8xf32>
    %cst_46 = arith.constant -1.000000e+30 : f32
    %104 = vector.broadcast %cst_46 : f32 to vector<8x8xf32>
    %105 = arith.select %8, %103, %104 : vector<8x8xi1>, vector<8x8xf32>
    %cst_47 = arith.constant dense<0xFF800000> : vector<8xf32>
    %106 = vector.multi_reduction <maximumf>, %105, %cst_47 [1] : vector<8x8xf32> to vector<8xf32>
    %107 = vector.shape_cast %106 : vector<8xf32> to vector<8x1xf32>
    %108 = vector.broadcast %107 : vector<8x1xf32> to vector<8x8xf32>
    %109 = arith.subf %105, %108 : vector<8x8xf32>
    %110 = math.exp %109 : vector<8x8xf32>
    %cst_48 = arith.constant dense<0.000000e+00> : vector<8xf32>
    %111 = vector.multi_reduction <add>, %110, %cst_48 [1] : vector<8x8xf32> to vector<8xf32>
    %112 = vector.shape_cast %111 : vector<8xf32> to vector<8x1xf32>
    %113 = tpu.reciprocal %112 {approx = true} : vector<8x1xf32> -> vector<8x1xf32>
    %114 = vector.broadcast %113 : vector<8x1xf32> to vector<8x8xf32>
    %115 = arith.mulf %110, %114 : vector<8x8xf32>
    %116 = vector.extract_strided_slice %20 {offsets = [0, 24], sizes = [8, 8], strides = [1, 1]} : vector<8x32xf32> to vector<8x8xf32>
    %cst_49 = arith.constant dense<0.000000e+00> : vector<8x8xf32>
    %117 = tpu.matmul %115, %116, %cst_49 {dimension_numbers = #tpu.dot_dimension_numbers<[1], [0], [0], [1], [0, 0, 1, 1], [], []>} : vector<8x8xf32>, vector<8x8xf32>, vector<8x8xf32> -> vector<8x8xf32>
    %c0_50 = arith.constant 0 : index
    %c24 = arith.constant 24 : index
    %118 = vector.load %arg19[%c0_50, %c24] : memref<8x32xf32, #tpu.memory_space<vmem>>, vector<8x8xf32>
    tpu.vector_store %arg19[%c0_50, %c24], %117 {strides = array<i32>} : memref<8x32xf32, #tpu.memory_space<vmem>>, vector<8x8xf32>,
    %c0_51 = arith.constant 0 : index
    %c0_52 = arith.constant 0 : index
    %119 = vector.load %arg19[%c0_51, %c0_52] : memref<8x32xf32, #tpu.memory_space<vmem>>, vector<8x32xf32>
    %120 = arith.truncf %119 : vector<8x32xf32> to vector<8x32xbf16>
    %c0_53 = arith.constant 0 : index
    %c0_54 = arith.constant 0 : index
    %c0_55 = arith.constant 0 : index
    %121 = vector.load %arg9[%c0_53, %c0_54, %c0_55] : memref<1x32x32xbf16, #tpu.memory_space<vmem>>, vector<1x32x32xbf16>
    %122 = vector.shape_cast %121 : vector<1x32x32xbf16> to vector<32x32xbf16>
    %cst_56 = arith.constant dense<0.000000e+00> : vector<8x32xf32>
    %123 = tpu.matmul %120, %122, %cst_56 {dimension_numbers = #tpu.dot_dimension_numbers<[1], [0], [0], [1], [0, 0, 1, 1], [], []>} : vector<8x32xbf16>, vector<32x32xbf16>, vector<8x32xf32> -> vector<8x32xf32>
    %124 = arith.addf %4, %123 : vector<8x32xf32>
    %cst_57 = arith.constant dense<0.000000e+00> : vector<8xf32>
    %125 = vector.multi_reduction <add>, %124, %cst_57 [1] : vector<8x32xf32> to vector<8xf32>
    %126 = vector.shape_cast %125 : vector<8xf32> to vector<8x1xf32>
    %cst_58 = arith.constant 3.200000e+01 : f32
    %127 = vector.broadcast %cst_58 : f32 to vector<8x1xf32>
    %128 = arith.divf %126, %127 : vector<8x1xf32>
    %129 = vector.broadcast %128 : vector<8x1xf32> to vector<8x32xf32>
    %130 = arith.subf %124, %129 : vector<8x32xf32>
    %131 = arith.mulf %130, %130 : vector<8x32xf32>
    %cst_59 = arith.constant dense<0.000000e+00> : vector<8xf32>
    %132 = vector.multi_reduction <add>, %131, %cst_59 [1] : vector<8x32xf32> to vector<8xf32>
    %133 = vector.shape_cast %132 : vector<8xf32> to vector<8x1xf32>
    %cst_60 = arith.constant 3.200000e+01 : f32
    %134 = vector.broadcast %cst_60 : f32 to vector<8x1xf32>
    %135 = arith.divf %133, %134 : vector<8x1xf32>
    %136 = vector.broadcast %128 : vector<8x1xf32> to vector<8x32xf32>
    %137 = arith.subf %124, %136 : vector<8x32xf32>
    %cst_61 = arith.constant 9.99999974E-6 : f32
    %138 = vector.broadcast %cst_61 : f32 to vector<8x1xf32>
    %139 = arith.addf %135, %138 : vector<8x1xf32>
    %140 = math.rsqrt %139 : vector<8x1xf32>
    %141 = vector.broadcast %140 : vector<8x1xf32> to vector<8x32xf32>
    %142 = arith.mulf %137, %141 : vector<8x32xf32>
    %c0_62 = arith.constant 0 : index
    %c0_63 = arith.constant 0 : index
    %c0_64 = arith.constant 0 : index
    %143 = vector.load %arg10[%c0_62, %c0_63, %c0_64] : memref<1x1x32xf32, #tpu.memory_space<vmem>>, vector<1x1x32xf32>
    %144 = vector.shape_cast %143 : vector<1x1x32xf32> to vector<1x32xf32>
    %145 = vector.broadcast %144 : vector<1x32xf32> to vector<8x32xf32>
    %146 = arith.mulf %142, %145 : vector<8x32xf32>
    %c0_65 = arith.constant 0 : index
    %c0_66 = arith.constant 0 : index
    %c0_67 = arith.constant 0 : index
    %147 = vector.load %arg11[%c0_65, %c0_66, %c0_67] : memref<1x1x32xf32, #tpu.memory_space<vmem>>, vector<1x1x32xf32>
    %148 = vector.shape_cast %147 : vector<1x1x32xf32> to vector<1x32xf32>
    %149 = vector.broadcast %148 : vector<1x32xf32> to vector<8x32xf32>
    %150 = arith.addf %146, %149 : vector<8x32xf32>
    %151 = arith.truncf %150 : vector<8x32xf32> to vector<8x32xbf16>
    %c0_68 = arith.constant 0 : index
    %c0_69 = arith.constant 0 : index
    %c0_70 = arith.constant 0 : index
    %152 = vector.load %arg12[%c0_68, %c0_69, %c0_70] : memref<1x32x64xbf16, #tpu.memory_space<vmem>>, vector<1x32x64xbf16>
    %153 = vector.shape_cast %152 : vector<1x32x64xbf16> to vector<32x64xbf16>
    %cst_71 = arith.constant dense<0.000000e+00> : vector<8x64xf32>
    %154 = tpu.matmul %151, %153, %cst_71 {dimension_numbers = #tpu.dot_dimension_numbers<[1], [0], [0], [1], [0, 0, 1, 1], [], []>} : vector<8x32xbf16>, vector<32x64xbf16>, vector<8x64xf32> -> vector<8x64xf32>
    %c0_72 = arith.constant 0 : index
    %c0_73 = arith.constant 0 : index
    %c0_74 = arith.constant 0 : index
    %155 = vector.load %arg13[%c0_72, %c0_73, %c0_74] : memref<1x1x64xf32, #tpu.memory_space<vmem>>, vector<1x1x64xf32>
    %156 = vector.shape_cast %155 : vector<1x1x64xf32> to vector<1x64xf32>
    %157 = vector.broadcast %156 : vector<1x64xf32> to vector<8x64xf32>
    %158 = arith.addf %154, %157 : vector<8x64xf32>
    %cst_75 = arith.constant 0.000000e+00 : f32
    %159 = vector.broadcast %cst_75 : f32 to vector<8x64xf32>
    %160 = arith.maximumf %158, %159 : vector<8x64xf32>
    %161 = arith.truncf %160 : vector<8x64xf32> to vector<8x64xbf16>
    %c0_76 = arith.constant 0 : index
    %c0_77 = arith.constant 0 : index
    %c0_78 = arith.constant 0 : index
    %162 = vector.load %arg14[%c0_76, %c0_77, %c0_78] : memref<1x64x32xbf16, #tpu.memory_space<vmem>>, vector<1x64x32xbf16>
    %163 = vector.shape_cast %162 : vector<1x64x32xbf16> to vector<64x32xbf16>
    %cst_79 = arith.constant dense<0.000000e+00> : vector<8x32xf32>
    %164 = tpu.matmul %161, %163, %cst_79 {dimension_numbers = #tpu.dot_dimension_numbers<[1], [0], [0], [1], [0, 0, 1, 1], [], []>} : vector<8x64xbf16>, vector<64x32xbf16>, vector<8x32xf32> -> vector<8x32xf32>
    %c0_80 = arith.constant 0 : index
    %c0_81 = arith.constant 0 : index
    %c0_82 = arith.constant 0 : index
    %165 = vector.load %arg15[%c0_80, %c0_81, %c0_82] : memref<1x1x32xf32, #tpu.memory_space<vmem>>, vector<1x1x32xf32>
    %166 = vector.shape_cast %165 : vector<1x1x32xf32> to vector<1x32xf32>
    %167 = vector.broadcast %166 : vector<1x32xf32> to vector<8x32xf32>
    %168 = arith.addf %164, %167 : vector<8x32xf32>
    %169 = arith.addf %150, %168 : vector<8x32xf32>
    %cst_83 = arith.constant dense<0.000000e+00> : vector<8xf32>
    %170 = vector.multi_reduction <add>, %169, %cst_83 [1] : vector<8x32xf32> to vector<8xf32>
    %171 = vector.shape_cast %170 : vector<8xf32> to vector<8x1xf32>
    %cst_84 = arith.constant 3.200000e+01 : f32
    %172 = vector.broadcast %cst_84 : f32 to vector<8x1xf32>
    %173 = arith.divf %171, %172 : vector<8x1xf32>
    %174 = vector.broadcast %173 : vector<8x1xf32> to vector<8x32xf32>
    %175 = arith.subf %169, %174 : vector<8x32xf32>
    %176 = arith.mulf %175, %175 : vector<8x32xf32>
    %cst_85 = arith.constant dense<0.000000e+00> : vector<8xf32>
    %177 = vector.multi_reduction <add>, %176, %cst_85 [1] : vector<8x32xf32> to vector<8xf32>
    %178 = vector.shape_cast %177 : vector<8xf32> to vector<8x1xf32>
    %cst_86 = arith.constant 3.200000e+01 : f32
    %179 = vector.broadcast %cst_86 : f32 to vector<8x1xf32>
    %180 = arith.divf %178, %179 : vector<8x1xf32>
    %181 = vector.broadcast %173 : vector<8x1xf32> to vector<8x32xf32>
    %182 = arith.subf %169, %181 : vector<8x32xf32>
    %cst_87 = arith.constant 9.99999974E-6 : f32
    %183 = vector.broadcast %cst_87 : f32 to vector<8x1xf32>
    %184 = arith.addf %180, %183 : vector<8x1xf32>
    %185 = math.rsqrt %184 : vector<8x1xf32>
    %186 = vector.broadcast %185 : vector<8x1xf32> to vector<8x32xf32>
    %187 = arith.mulf %182, %186 : vector<8x32xf32>
    %c0_88 = arith.constant 0 : index
    %c0_89 = arith.constant 0 : index
    %c0_90 = arith.constant 0 : index
    %188 = vector.load %arg16[%c0_88, %c0_89, %c0_90] : memref<1x1x32xf32, #tpu.memory_space<vmem>>, vector<1x1x32xf32>
    %189 = vector.shape_cast %188 : vector<1x1x32xf32> to vector<1x32xf32>
    %190 = vector.broadcast %189 : vector<1x32xf32> to vector<8x32xf32>
    %191 = arith.mulf %187, %190 : vector<8x32xf32>
    %c0_91 = arith.constant 0 : index
    %c0_92 = arith.constant 0 : index
    %c0_93 = arith.constant 0 : index
    %192 = vector.load %arg17[%c0_91, %c0_92, %c0_93] : memref<1x1x32xf32, #tpu.memory_space<vmem>>, vector<1x1x32xf32>
    %193 = vector.shape_cast %192 : vector<1x1x32xf32> to vector<1x32xf32>
    %194 = vector.broadcast %193 : vector<1x32xf32> to vector<8x32xf32>
    %195 = arith.addf %191, %194 : vector<8x32xf32>
    %c0_94 = arith.constant 0 : index
    %c0_95 = arith.constant 0 : index
    %c0_96 = arith.constant 0 : index
    %196 = vector.load %arg18[%c0_94, %c0_95, %c0_96] : memref<1x8x32xf32, #tpu.memory_space<vmem>>, vector<1x8x32xf32>
    %197 = vector.shape_cast %196 : vector<1x8x32xf32> to vector<8x32xf32>
    %198 = vector.shape_cast %195 : vector<8x32xf32> to vector<1x8x32xf32>
    tpu.vector_store %arg18[%c0_94, %c0_95, %c0_96], %198 {strides = array<i32>} : memref<1x8x32xf32, #tpu.memory_space<vmem>>, vector<1x8x32xf32>,
    return
  }
  func.func @transform_0(%arg0: i32, %arg1: i32) -> (i32, i32, i32) {
    %c0_i32 = arith.constant 0 : i32
    %c0_i32_0 = arith.constant 0 : i32
    %c0_i32_1 = arith.constant 0 : i32
    return %arg0, %c0_i32, %c0_i32_0 : i32, i32, i32
  }
  func.func @transform_1(%arg0: i32, %arg1: i32) -> (i32, i32, i32) {
    %c0_i32 = arith.constant 0 : i32
    %c0_i32_0 = arith.constant 0 : i32
    %c0_i32_1 = arith.constant 0 : i32
    return %arg0, %c0_i32, %c0_i32_0 : i32, i32, i32
  }
  func.func @transform_2(%arg0: i32, %arg1: i32) -> (i32, i32) {
    %c0_i32 = arith.constant 0 : i32
    %c0_i32_0 = arith.constant 0 : i32
    %c0_i32_1 = arith.constant 0 : i32
    return %c0_i32, %c0_i32_0 : i32, i32
  }
  func.func @transform_3(%arg0: i32, %arg1: i32) -> (i32, i32) {
    %c0_i32 = arith.constant 0 : i32
    %c0_i32_0 = arith.constant 0 : i32
    %c0_i32_1 = arith.constant 0 : i32
    return %c0_i32, %c0_i32_0 : i32, i32
  }
  func.func @transform_4(%arg0: i32, %arg1: i32) -> (i32, i32) {
    %c0_i32 = arith.constant 0 : i32
    %c0_i32_0 = arith.constant 0 : i32
    %c0_i32_1 = arith.constant 0 : i32
    return %c0_i32, %c0_i32_0 : i32, i32
  }
  func.func @transform_5(%arg0: i32, %arg1: i32) -> (i32, i32, i32) {
    %c0_i32 = arith.constant 0 : i32
    %c0_i32_0 = arith.constant 0 : i32
    %c0_i32_1 = arith.constant 0 : i32
    return %arg1, %c0_i32, %c0_i32_0 : i32, i32, i32
  }
  func.func @transform_6(%arg0: i32, %arg1: i32) -> (i32, i32, i32) {
    %c0_i32 = arith.constant 0 : i32
    %c0_i32_0 = arith.constant 0 : i32
    %c0_i32_1 = arith.constant 0 : i32
    return %arg1, %c0_i32, %c0_i32_0 : i32, i32, i32
  }
  func.func @transform_7(%arg0: i32, %arg1: i32) -> (i32, i32, i32) {
    %c0_i32 = arith.constant 0 : i32
    %c0_i32_0 = arith.constant 0 : i32
    %c0_i32_1 = arith.constant 0 : i32
    return %arg1, %c0_i32, %c0_i32_0 : i32, i32, i32
  }
  func.func @transform_8(%arg0: i32, %arg1: i32) -> (i32, i32, i32) {
    %c0_i32 = arith.constant 0 : i32
    %c0_i32_0 = arith.constant 0 : i32
    %c0_i32_1 = arith.constant 0 : i32
    return %arg1, %c0_i32, %c0_i32_0 : i32, i32, i32
  }
  func.func @transform_9(%arg0: i32, %arg1: i32) -> (i32, i32, i32) {
    %c0_i32 = arith.constant 0 : i32
    %c0_i32_0 = arith.constant 0 : i32
    %c0_i32_1 = arith.constant 0 : i32
    return %arg1, %c0_i32, %c0_i32_0 : i32, i32, i32
  }
  func.func @transform_10(%arg0: i32, %arg1: i32) -> (i32, i32, i32) {
    %c0_i32 = arith.constant 0 : i32
    %c0_i32_0 = arith.constant 0 : i32
    %c0_i32_1 = arith.constant 0 : i32
    return %arg1, %c0_i32, %c0_i32_0 : i32, i32, i32
  }
  func.func @transform_11(%arg0: i32, %arg1: i32) -> (i32, i32, i32) {
    %c0_i32 = arith.constant 0 : i32
    %c0_i32_0 = arith.constant 0 : i32
    %c0_i32_1 = arith.constant 0 : i32
    return %arg1, %c0_i32, %c0_i32_0 : i32, i32, i32
  }
  func.func @transform_12(%arg0: i32, %arg1: i32) -> (i32, i32, i32) {
    %c0_i32 = arith.constant 0 : i32
    %c0_i32_0 = arith.constant 0 : i32
    %c0_i32_1 = arith.constant 0 : i32
    return %arg1, %c0_i32, %c0_i32_0 : i32, i32, i32
  }
  func.func @transform_13(%arg0: i32, %arg1: i32) -> (i32, i32, i32) {
    %c0_i32 = arith.constant 0 : i32
    %c0_i32_0 = arith.constant 0 : i32
    %c0_i32_1 = arith.constant 0 : i32
    return %arg1, %c0_i32, %c0_i32_0 : i32, i32, i32
  }
  func.func @transform_14(%arg0: i32, %arg1: i32) -> (i32, i32, i32) {
    %c0_i32 = arith.constant 0 : i32
    %c0_i32_0 = arith.constant 0 : i32
    %c0_i32_1 = arith.constant 0 : i32
    return %arg1, %c0_i32, %c0_i32_0 : i32, i32, i32
  }
  func.func @transform_15(%arg0: i32, %arg1: i32) -> (i32, i32, i32) {
    %c0_i32 = arith.constant 0 : i32
    %c0_i32_0 = arith.constant 0 : i32
    %c0_i32_1 = arith.constant 0 : i32
    return %arg1, %c0_i32, %c0_i32_0 : i32, i32, i32
  }
  func.func @transform_16(%arg0: i32, %arg1: i32) -> (i32, i32, i32) {
    %c0_i32 = arith.constant 0 : i32
    %c0_i32_0 = arith.constant 0 : i32
    %c0_i32_1 = arith.constant 0 : i32
    return %arg0, %c0_i32, %c0_i32_0 : i32, i32, i32
  }
}

</mosaic_0001>

<bundles_post_ra>
// kernel: tpu_custom_call.1
= control target key start
LH: loop header
LB: loop body
LE: loop exit
PB: predicated region body
PF: predicated region fallthrough
CT: control target
= control target key end

     0   :  { %s3752_s0 = inlined_call_operand.hbm [shape: bf16[2,8,32], index: 0, kind: input, shape index: {}]   ;;  %s3753_s1 = inlined_call_operand.hbm [shape: s32[2,8,8], index: 1, kind: input, shape index: {}]   ;;  %s3754_s2 = inlined_call_operand.hbm [shape: f32[8,32], index: 2, kind: input, shape index: {}]   ;;  %s3755_s3 = inlined_call_operand.vmem [shape: f32[4,32], index: 3, kind: input, shape index: {}]   ;;  %s3756_s4 = inlined_call_operand.vmem [shape: f32[4,32], index: 4, kind: input, shape index: {}]   ;;  %s3757_s5 = inlined_call_operand.vmem [shape: bf16[2,32,32], index: 5, kind: input, shape index: {}]   ;;  %s3758_s6 = inlined_call_operand.vmem [shape: bf16[2,32,96], index: 6, kind: input, shape index: {}]   ;;  %s3759_s7 = inlined_call_operand.vmem [shape: bf16[2,32,32], index: 7, kind: input, shape index: {}]   ;;  %s3760_s8 = inlined_call_operand.vmem [shape: f32[2,1,32], index: 8, kind: input, shape index: {}]   ;;  %s3761_s9 = inlined_call_operand.vmem [shape: f32[2,1,32], index: 9, kind: input, shape index: {}]   ;;  %s3762_s10 = inlined_call_operand.hbm [shape: bf16[2,32,64], index: 10, kind: input, shape index: {}]   ;;  %s3763_s11 = inlined_call_operand.hbm [shape: f32[2,1,64], index: 11, kind: input, shape index: {}]   ;;  %s3764_s12 = inlined_call_operand.vmem [shape: bf16[2,64,32], index: 12, kind: input, shape index: {}]   ;;  %s3765_s13 = inlined_call_operand.vmem [shape: f32[2,1,32], index: 13, kind: input, shape index: {}]   ;;  %s3766_s14 = inlined_call_operand.vmem [shape: f32[2,1,32], index: 14, kind: input, shape index: {}]   ;;  %s3767_s15 = inlined_call_operand.vmem [shape: f32[2,1,32], index: 15, kind: input, shape index: {}]   ;;  %s3768_s16 = inlined_call_operand.hbm [shape: f32[2,8,32], index: 16, kind: output, shape index: {}]  }
   0x1   :  { %3797 = sst [smem:[#allocation34_spill]] %s3752_s0 }
   0x2   :  { %3798 = sst [smem:[#allocation35_spill]] %s3753_s1 }
   0x3   :  { %3799 = sst [smem:[#allocation36_spill]] %s3754_s2 }
   0x4   :  { %3800 = sst [smem:[#allocation37_spill]] %s3755_s3 }
   0x5   :  { %3801 = sst [smem:[#allocation38_spill]] %s3756_s4 }
   0x6   :  { %3802 = sst [smem:[#allocation39_spill]] %s3757_s5 }
   0x7   :  { %3803 = sst [smem:[#allocation40_spill]] %s3758_s6 }
   0x8   :  { %3804 = sst [smem:[#allocation41_spill]] %s3759_s7 }
   0x9   :  { %3805 = sst [smem:[#allocation42_spill]] %s3760_s8 }
   0xa   :  { %3806 = sst [smem:[#allocation43_spill]] %s3761_s9 }
   0xb   :  { %3807 = sst [smem:[#allocation44_spill]] %s3762_s10 }
   0xc   :  { %3808 = sst [smem:[#allocation45_spill]] %s3763_s11 }
   0xd   :  { %3809 = sst [smem:[#allocation46_spill]] %s3764_s12 }
   0xe   :  { %3810 = sst [smem:[#allocation47_spill]] %s3765_s13 }
   0xf   :  { %3811 = sst [smem:[#allocation48_spill]] %s3766_s14 }
  0x10   :  { %3812 = sst [smem:[#allocation49_spill]] %s3767_s15 }
  0x11   :  { %3813 = sst [smem:[#allocation50_spill]] %s3768_s16 }
  0x12   :  { %21 = vsyncpa [#allocation4], 0 }
  0x13   :  { %23 = vsyncpa [#allocation4 + $0x1], 0 }
  0x14   :  { %24 = vsyncpa [#allocation7], 0 }
  0x15   :  { %26 = vsyncpa [#allocation7 + $0x1], 0 }
  0x16   :  { %27 = vsyncpa [#allocation10], 0 }
  0x17   :  { %29 = vsyncpa [#allocation10 + $0x1], 0 }
  0x18   :  { %30 = vsyncpa [#allocation5], 0 }
  0x19   :  { %32 = vsyncpa [#allocation5 + $0x1], 0  ;;  %s3133_s21 = smov 0   ;;  %s3135_s22 = smov 0  }
  0x1a   :  { %s3137_s23 = smov 0   ;;  %s3139_s24 = smov 0  }
  0x1b   :  { %s3141_s25 = smov 0   ;;  %s3143_s26 = smov 0  }
  0x1c   :  { %s3145_s27 = smov 0   ;;  %s3147_s28 = smov 0  }
  0x1d   :  { %s3149_s29 = smov 0   ;;  %s3151_s30 = smov 0  }
  0x1e   :  { %s3153_s0 = smov 0  }
  0x1f LB: > { %3814 = sst [smem:[#allocation18_spill]] %s2985_s22  ;;  %s3187_s17 = sadd.s32 4294967295, %s3021_s0   ;;  %s3021_s0 = sphi %s3153_s0, %s38_s0   ;;  %s3017_s30 = sphi %s3151_s30, %s3896_s30   ;;  %s3013_s29 = sphi %s3149_s29, %s3895_s29   ;;  %s3009_s28 = sphi %s3147_s28, %s3894_s28   ;;  %s3005_s27 = sphi %s3145_s27, %s3893_s27   ;;  %s3001_s26 = sphi %s3143_s26, %s3892_s26   ;;  %s2997_s25 = sphi %s3141_s25, %s3891_s25   ;;  %s2993_s24 = sphi %s3139_s24, %s3890_s24   ;;  %s2989_s23 = sphi %s3137_s23, %s3889_s23   ;;  %s2985_s22 = sphi %s3135_s22, %s3888_s22   ;;  %s2981_s21 = sphi %s3133_s21, %s3887_s21  }
  0x20   : > { %3815 = sst [smem:[#allocation19_spill]] %s2989_s23  ;;  %s2352_s18 = sadd.s32 4294967294, %s3021_s0  }
  0x21   : > { %3816 = sst [smem:[#allocation20_spill]] %s2993_s24  ;;  %p70_p0 = scmp.ne.s32.totalorder %s2997_s25, %s2993_s24 }
  0x22   : > { %3817 = sst [smem:[#allocation21_spill]] %s2997_s25  ;;  %p3773_p1 = scmp.eq.s32.totalorder %s3187_s17, 0 }
  0x23   : > { %3818 = sst [smem:[#allocation22_spill]] %s3001_s26  ;;  %p315_p2 = scmp.ne.s32.totalorder %s2985_s22, %s2981_s21 }
  0x24   : > { %3819 = sst [smem:[#allocation23_spill]] %s3009_s28  ;;  %p3197_p4 = por %p3773_p1, %p70_p0 }
  0x25   : > { %3820 = sst [smem:[#allocation24_spill]] %s3013_s29  ;;  %p475_p5 = scmp.eq.s32.totalorder %s2352_s18, 3 }
  0x26   : > { %3821 = sst [smem:[#allocation25_spill]] %s3017_s30  ;;  %p3203_p6 = por %p315_p2, %p3773_p1 }
  0x27   : > { %3822 = sst [smem:[#allocation26_spill]] %s3021_s0  ;;  %p2353_p7 = scmp.ge.s32.totalorder %s3021_s0, 1 }
  0x28   : > { %s3823_s19 = scalar_select %p3197_p4, 1, 0 }
  0x29   : > { %s3824_s20 = scalar_select %p3203_p6, 1, 0 }
  0x2a   : > { %p3208_p8 = por %p475_p5, %p70_p0  ;;  %p482_p9 = scmp.lt.s32.totalorder %s3021_s0, 5 }
  0x2b   : > { %s3023_s24 = smov [#allocation8]   ;;  %s47_s3 = sadd.s32 1, %s3013_s29 }
  0x2c   : > { %s3825_s16 = scalar_select %p3208_p8, 1, 0 }
  0x2d   : > { %p3213_p10 = pnand %p2353_p7, %p482_p9  ;;  %s495_s28 = sshll.u32 %s3023_s24, 4  ;;  %s496_s28 = int_to_ptr.vmem [resolvable:$true] %s495_s28 }
  0x2e   : > { %3826 = sst [smem:[#allocation27_spill]] %s3825_s16  ;;  %p3227_p0 = scmp.ge.s32.totalorder %s47_s3, 2 }
  0x2f   : > { %s3827_s21 = scalar_select %p3213_p10, 1, 0 }
  0x30   : > { %p2574_p11 = pneg %p3213_p10  ;;  %s3830_s2 = sld [smem:[#allocation36_spill]] }
  0x31   : > { %s3829_s16 = scalar_select %p3227_p0, 1, 0 }
  0x32   : > { %p3221_p12 = pnand %p2574_p11, %p3773_p1 }
  0x34   : > { %p2741_p5 = pneg %p3221_p12 }
  0x36   : > { %s2739_s14 = scalar_lea.hbm %s3830_s2, 128 }
  0x37   : > { %p2740_p2 = scmp.ne.s32.totalorder %s3830_s2, %s2739_s14  ;;  %p2746_p11 = scmp.lt.u32.totalorder %s2739_s14, %s3830_s2 }
  0x39   : > { %p2742_p7 = pnand %p2741_p5, %p2740_p2 }
  0x3b   : > { %p2743_p9 = pneg %p2742_p7 }
  0x3d   : > { %p2748_p1 = pnand %p2746_p11, %p2743_p9 }
  0x3f   : > { %2751 = shalt.err (!%p2748_p1)
}
  0x40   : > { %s2752_s7 = scalar_lea.vmem %s496_s28, 128  ;;  %p2760_p6 = scmp.lt.s32.totalorder %s496_s28, %s496_s28 }
  0x41   : > { %p2753_p3 = scmp.ne.s32.totalorder %s496_s28, %s2752_s7  ;;  %p2761_p4 = scmp.lt.s32.totalorder %s2752_s7, %s2752_s7 }
  0x43   : > { %p2755_p13 = pnand %p2753_p3, %p2741_p5  ;;  %p2762_p10 = por %p2761_p4, %p2760_p6 }
  0x45   : > { %p2756_p8 = pneg %p2755_p13 }
  0x47   : > { %p2763_p0 = pnand %p2762_p10, %p2756_p8 }
  0x49   : > { %2766 = shalt.err (!%p2763_p0)
}
  0x4a   : > { %2577 = dma.hbm_to_vmem [thread:$0]  (!%p3221_p12), %s3830_s2, 128, %s496_s28, [#allocation7]  }
  0x4b   : > { %p3831_p1 = scmp.ne.s32.totalorder %s3829_s16, 0  ;;  %s302_s7 = sadd.s32 1, %s2989_s23 }
  0x4c   : > { %p309_p3 = scmp.ne.s32.totalorder %s2989_s23, %s2985_s22  ;;  %p3781_p4 = scmp.lt.s32.totalorder %s3021_s0, 4 }
  0x4d   : > { %s3898_s3 = smov (%p3831_p1, %s47_s3), 0  ;;  %p3833_p8 = scmp.eq.s32.totalorder %s3021_s0, 0 }
  0x4e   : > { %3832 = sst [smem:[#allocation28_spill]] %s3898_s3  ;;  %s299_s9 = ssub.s32 %s3013_s29, %s3898_s3 }
  0x4f   : > { %p300_p6 = scmp.eq.s32.totalorder %s299_s9, 0  ;;  %p311_p10 = por %p309_p3, %p3833_p8 }
  0x50   : > { %s3780_s13 = sand.u32 1, %s3021_s0   ;;  %s3778_s14 = sand.u32 1, %s2989_s23  }
  0x51   : > { %s3262_s15 = scalar_select %p300_p6, %s2989_s23, %s302_s7  }
  0x52   : > { %s2360_s18 = sshll.u32 %s3778_s14, 4  ;;  %s2422_s28 = sshll.u32 %s3013_s29, 8 }
  0x53   : > { %3834 = sst [smem:[#allocation29_spill]] %s3262_s15  ;;  %s3835_s10 = sld [smem:[#allocation44_spill]] }
  0x54   : > { %s588_s2 = scalar_lea.vmem [#allocation9], %s2360_s18  ;;  %p3276_p12 = pnand %p3781_p4, %p311_p10 }
  0x55   : > { %s595_s9 = sshll.u32 %s588_s2, 4  ;;  %s3282_s14 = scalar_lea.sflag [#allocation10], %s3780_s13  ;;  %s3272_s9 = int_to_ptr.vmem [resolvable:$true] %s595_s9 }
  0x56   : > { %p3785_p0 = pneg %p3276_p12 }
  0x59   : > { %s3270_s12 = scalar_lea.hbm %s3835_s10, %s2422_s28  ;;  %s2772_s24 = scalar_lea.hbm %s3835_s10, 512 }
  0x5a   : > { %s2767_s28 = scalar_lea.hbm %s3270_s12, 256  ;;  %p2773_p7 = scmp.lt.u32.totalorder %s3270_s12, %s3835_s10 }
  0x5b   : > { %p2768_p13 = scmp.ne.s32.totalorder %s3270_s12, %s2767_s28  ;;  %p2774_p9 = scmp.lt.u32.totalorder %s2772_s24, %s2767_s28 }
  0x5c   : > { %p2776_p3 = scmp.lt.u32.totalorder %s2767_s28, %s3270_s12 }
  0x5d   : > { %p2770_p2 = pnand %p3785_p0, %p2768_p13  ;;  %p2775_p11 = por %p2774_p9, %p2773_p7 }
  0x5f   : > { %p2771_p5 = pneg %p2770_p2  ;;  %p2777_p6 = por %p2776_p3, %p2775_p11 }
  0x61   : > { %p2778_p8 = pnand %p2777_p6, %p2771_p5 }
  0x63   : > { %2781 = shalt.err (!%p2778_p8)
}
  0x64   : > { %s2782_s13 = scalar_lea.vmem %s3272_s9, 256  ;;  %s3024_s2 = smov [#allocation9]  }
  0x65   : > { %p2783_p10 = scmp.ne.s32.totalorder %s3272_s9, %s2782_s13  ;;  %s2787_s18 = sshll.u32 %s3024_s2, 4  ;;  %s2788_s18 = int_to_ptr.vmem [resolvable:$false] %s2787_s18 }
  0x66   : > { %s2789_s3 = scalar_lea.vmem %s2788_s18, 512  ;;  %p2790_p4 = scmp.lt.s32.totalorder %s3272_s9, %s2788_s18 }
  0x67   : > { %p2785_p13 = pnand %p2783_p10, %p3785_p0  ;;  %p2791_p7 = scmp.lt.s32.totalorder %s2789_s3, %s2782_s13 }
  0x69   : > { %p2786_p2 = pneg %p2785_p13  ;;  %p2792_p9 = por %p2791_p7, %p2790_p4 }
  0x6b   : > { %p2793_p11 = pnand %p2792_p9, %p2786_p2 }
  0x6d   : > { %2796 = shalt.err (!%p2793_p11)
}
  0x6e   : > { %s3025_s28 = smov 64   ;;  %s3026_s13 = smov 4  }
  0x6f   : > { %2587 = dma.hbm_to_vmem [thread:$0]  (!%p3276_p12), %s3270_s12, 256, %s3272_s9, %s3282_s14, %s3025_s28, %s3025_s28, %s3026_s13  }
  0x70   : > { %s57_s24 = sadd.s32 1, %s3001_s26  ;;  %s50_s4 = sadd.s32 1, %s3017_s30 }
  0x71   : > { %p64_p4 = scmp.ne.s32.totalorder %s3001_s26, %s2997_s25  ;;  %s3900_s4 = smov (!%p3831_p1, %s50_s4), %s3017_s30 }
  0x72   : > { %p3837_p5 = scmp.eq.s32.totalorder %s3021_s0, 0  ;;  %p3839_p6 = scmp.eq.s32.totalorder %s3187_s17, 3 }
  0x73   : > { %p52_p10 = scmp.ge.s32.totalorder %s3900_s4, 2  ;;  %s3330_s12 = sand.u32 1, %s3001_s26  }
  0x74   : > { %p3319_p3 = por %p3837_p5, %p64_p4  ;;  %p3325_p8 = por %p3839_p6, %p64_p4 }
  0x75   : > { %s2356_s9 = sshll.u32 %s3330_s12, 2  ;;  %s3902_s4 = smov (%p52_p10, %s3900_s4), 0 }
  0x76   : > { %s3840_s18 = scalar_select %p3325_p8, 1, 0 }
  0x77   : > { %3842 = sst [smem:[#allocation31_spill]] %s3902_s4  ;;  %s2357_s16 = sshll.u32 %s3017_s30, 6 }
  0x78   : > { %3841 = sst [smem:[#allocation30_spill]] %s3840_s18  ;;  %s54_s3 = ssub.s32 %s3017_s30, %s3902_s4 }
  0x79   : > { %s3843_s10 = sld [smem:[#allocation34_spill]]  ;;  %p55_p1 = scmp.eq.s32.totalorder %s54_s3, 0 }
  0x7a   : > { %s516_s18 = scalar_lea.vmem [#allocation3], %s2356_s9  ;;  %p3844_p13 = scmp.lt.s32.totalorder %s3021_s0, 4 }
  0x7b   : > { %s523_s6 = sshll.u32 %s516_s18, 4  ;;  %s3343_s6 = int_to_ptr.vmem [resolvable:$true] %s523_s6 }
  0x7c   : > { %p3349_p2 = pnand %p3844_p13, %p3319_p3 }
  0x7d   : > { %s3354_s28 = scalar_select %p55_p1, %s3001_s26, %s57_s24  }
  0x7e   : > { %p2799_p9 = pneg %p3349_p2 }
  0x7f   : > { %s3341_s15 = scalar_lea.hbm %s3843_s10, %s2357_s16  ;;  %3846 = sst [smem:[#allocation32_spill]] %s3354_s28 }
  0x80   : > { %s513_s16 = scalar_lea.sflag [#allocation4], %s3330_s12  ;;  %s2797_s13 = scalar_lea.hbm %s3341_s15, 64 }
  0x81   : > { %p2798_p7 = scmp.ne.s32.totalorder %s3341_s15, %s2797_s13  ;;  %s2802_s9 = scalar_lea.hbm %s3843_s10, 128 }
  0x82   : > { %p2803_p5 = scmp.lt.u32.totalorder %s3341_s15, %s3843_s10  ;;  %p2804_p3 = scmp.lt.u32.totalorder %s2802_s9, %s2797_s13 }
  0x83   : > { %p2800_p11 = pnand %p2799_p9, %p2798_p7  ;;  %p2806_p10 = scmp.lt.u32.totalorder %s2797_s13, %s3341_s15 }
  0x84   : > { %p2805_p6 = por %p2804_p3, %p2803_p5 }
  0x85   : > { %p2801_p4 = pneg %p2800_p11 }
  0x86   : > { %p2807_p1 = por %p2806_p10, %p2805_p6 }
  0x88   : > { %p2808_p13 = pnand %p2807_p1, %p2801_p4 }
  0x8a   : > { %2811 = shalt.err (!%p2808_p13)
}
  0x8b   : > { %s2812_s24 = scalar_lea.vmem %s3343_s6, 64  ;;  %s3027_s18 = smov [#allocation3]  }
  0x8c   : > { %p2813_p7 = scmp.ne.s32.totalorder %s3343_s6, %s2812_s24  ;;  %s2817_s2 = sshll.u32 %s3027_s18, 4  ;;  %s2818_s2 = int_to_ptr.vmem [resolvable:$false] %s2817_s2 }
  0x8d   : > { %s2819_s4 = scalar_lea.vmem %s2818_s2, 128  ;;  %p2820_p8 = scmp.lt.s32.totalorder %s3343_s6, %s2818_s2 }
  0x8e   : > { %p2815_p11 = pnand %p2813_p7, %p2799_p9  ;;  %p2821_p5 = scmp.lt.s32.totalorder %s2819_s4, %s2812_s24 }
  0x90   : > { %p2816_p0 = pneg %p2815_p11  ;;  %p2822_p3 = por %p2821_p5, %p2820_p8 }
  0x92   : > { %p2823_p6 = pnand %p2822_p3, %p2816_p0 }
  0x94   : > { %2826 = shalt.err (!%p2823_p6)
}
  0x95   : > { %2581 = dma.hbm_to_vmem [thread:$0]  (!%p3349_p2), %s3341_s15, 64, %s3343_s6, %s513_s16  }
  0x96   : > { %s2358_s13 = sshll.u32 %s3330_s12, 3  ;;  %s2359_s9 = sshll.u32 %s3017_s30, 7 }
  0x97   : > { %s3847_s1 = sld [smem:[#allocation35_spill]]  ;;  %s534_s24 = scalar_lea.vmem [#allocation6], %s2358_s13 }
  0x98   : > { %s541_s4 = sshll.u32 %s534_s24, 4  ;;  %s2363_s10 = sshll.u32 %s3013_s29, 4  ;;  %s3389_s4 = int_to_ptr.vmem [resolvable:$true] %s541_s4 }
  0x99   : > { %s3848_s28 = sand.u32 1, %s3021_s0  }
  0x9a   : > { %s531_s26 = scalar_lea.sflag [#allocation7], %s3848_s28 }
  0x9d   : > { %s3387_s2 = scalar_lea.hbm %s3847_s1, %s2359_s9  ;;  %s2832_s12 = scalar_lea.hbm %s3847_s1, 256 }
  0x9e   : > { %s2827_s8 = scalar_lea.hbm %s3387_s2, 128  ;;  %p2833_p10 = scmp.lt.u32.totalorder %s3387_s2, %s3847_s1 }
  0x9f   : > { %p2828_p0 = scmp.ne.s32.totalorder %s3387_s2, %s2827_s8  ;;  %p2834_p1 = scmp.lt.u32.totalorder %s2832_s12, %s2827_s8 }
  0xa0   : > { %p2836_p7 = scmp.lt.u32.totalorder %s2827_s8, %s3387_s2 }
  0xa1   : > { %p2830_p8 = pnand %p2828_p0, %p2799_p9  ;;  %p2835_p13 = por %p2834_p1, %p2833_p10 }
  0xa3   : > { %p2831_p4 = pneg %p2830_p8  ;;  %p2837_p11 = por %p2836_p7, %p2835_p13 }
  0xa5   : > { %p2838_p5 = pnand %p2837_p11, %p2831_p4 }
  0xa7   : > { %2841 = shalt.err (!%p2838_p5)
}
  0xa8   : > { %s2842_s28 = scalar_lea.vmem %s3389_s4, 128  ;;  %s3028_s13 = smov [#allocation6]  }
  0xa9   : > { %p2843_p3 = scmp.ne.s32.totalorder %s3389_s4, %s2842_s28  ;;  %s2847_s3 = sshll.u32 %s3028_s13, 4  ;;  %s2848_s3 = int_to_ptr.vmem [resolvable:$false] %s2847_s3 }
  0xaa   : > { %s2849_s18 = scalar_lea.vmem %s2848_s3, 256  ;;  %p2850_p8 = scmp.lt.s32.totalorder %s3389_s4, %s2848_s3 }
  0xab   : > { %p2845_p6 = pnand %p2843_p3, %p2799_p9  ;;  %p2851_p10 = scmp.lt.s32.totalorder %s2849_s18, %s2842_s28 }
  0xad   : > { %p2846_p0 = pneg %p2845_p6  ;;  %p2852_p1 = por %p2851_p10, %p2850_p8 }
  0xaf   : > { %p2853_p13 = pnand %p2852_p1, %p2846_p0 }
  0xb1   : > { %2856 = shalt.err (!%p2853_p13)
}
  0xb2   : > { %2584 = dma.hbm_to_vmem [thread:$0]  (!%p3349_p2), %s3387_s2, 128, %s3389_s4, %s531_s26  }
  0xb3   : > { %s3849_s11 = sld [smem:[#allocation45_spill]]  ;;  %s3850_s15 = sand.u32 1, %s2989_s23  }
  0xb4   : > { %s608_s12 = scalar_lea.vmem [#allocation11], %s3850_s15  ;;  %p3851_p4 = pneg %p3276_p12 }
  0xb5   : > { %s615_s16 = sshll.u32 %s608_s12, 4  ;;  %s616_s16 = int_to_ptr.vmem [resolvable:$true] %s615_s16 }
  0xb9   : > { %s3422_s6 = scalar_lea.hbm %s3849_s11, %s2363_s10  ;;  %s2862_s4 = scalar_lea.hbm %s3849_s11, 32 }
  0xba   : > { %s2857_s5 = scalar_lea.hbm %s3422_s6, 16  ;;  %p2863_p11 = scmp.lt.u32.totalorder %s3422_s6, %s3849_s11 }
  0xbb   : > { %p2858_p9 = scmp.ne.s32.totalorder %s3422_s6, %s2857_s5  ;;  %p2864_p5 = scmp.lt.u32.totalorder %s2862_s4, %s2857_s5 }
  0xbc   : > { %p2866_p6 = scmp.lt.u32.totalorder %s2857_s5, %s3422_s6 }
  0xbd   : > { %p2860_p7 = pnand %p2858_p9, %p3851_p4  ;;  %p2865_p3 = por %p2864_p5, %p2863_p11 }
  0xbf   : > { %p2861_p2 = pneg %p2860_p7  ;;  %p2867_p0 = por %p2866_p6, %p2865_p3 }
  0xc1   : > { %p2868_p8 = pnand %p2867_p0, %p2861_p2 }
  0xc3   : > { %2871 = shalt.err (!%p2868_p8)
}
  0xc4   : > { %s2872_s28 = scalar_lea.vmem %s616_s16, 16  ;;  %p3852_p1 = pmov %p3851_p4 }
  0xc5   : > { %p2873_p10 = scmp.ne.s32.totalorder %s616_s16, %s2872_s28  ;;  %s3029_s13 = smov [#allocation11]  }
  0xc6   : > { %s2877_s3 = sshll.u32 %s3029_s13, 4  ;;  %s2878_s3 = int_to_ptr.vmem [resolvable:$false] %s2877_s3 }
  0xc7   : > { %p2875_p13 = pnand %p2873_p10, %p3852_p1  ;;  %s2879_s18 = scalar_lea.vmem %s2878_s3, 32 }
  0xc8   : > { %p2880_p4 = scmp.lt.s32.totalorder %s616_s16, %s2878_s3  ;;  %p2881_p7 = scmp.lt.s32.totalorder %s2879_s18, %s2872_s28 }
  0xc9   : > { %p2876_p9 = pneg %p2875_p13 }
  0xca   : > { %p2882_p5 = por %p2881_p7, %p2880_p4 }
  0xcc   : > { %p2883_p11 = pnand %p2882_p5, %p2876_p9 }
  0xce   : > { %2886 = shalt.err (!%p2883_p11)
}
  0xcf   : > { %2590 = dma.hbm_to_vmem [thread:$0]  (!%p3276_p12), %s3422_s6, 16, %s616_s16, %s3282_s14  }
  0xd0   : > { %p3853_p2 = scmp.ne.s32.totalorder %s3827_s21, 0 }
  0xd2   : > { %650 = sbr.rel (%p3853_p2) target bundleno = 2919 (0xb67), region = 84 }
  0xd9   : > { %s3449_s8 = sand.u32 1, %s2997_s25   ;;  %p3855_p3 = scmp.ne.s32.totalorder %s3823_s19, 0 }
  0xda   : > { %3854 = sst [smem:[#allocation33_spill]] %s3449_s8  ;;  %s2365_s24 = sshll.u32 %s3449_s8, 2 }
  0xdb   : > { %s653_s15 = scalar_lea.sflag [#allocation4], %s3449_s8  ;;  %s3453_s12 = scalar_lea.vmem [#allocation3], %s2365_s24 }
  0xdc   : > { %2960 = dma.done.wait (%p3855_p3), %s653_s15, 64  }
  0xdd   : > { %2962 = vsyncadd (%p3855_p3), %s653_s15, 4294967232  ;;  %s661_s21 = sand.u32 1, %s3187_s17   ;;  %s2366_s14 = sshll.u32 %s3449_s8, 3 }
  0xde   : > { %s662_s7 = scalar_lea.sflag [#allocation7], %s661_s21  ;;  %s3461_s6 = scalar_lea.vmem [#allocation6], %s2366_s14 }
  0xdf   : > { %2964 = dma.done.wait (%p3855_p3), %s662_s7, 128  }
  0xe0   : > { %2966 = vsyncadd (%p3855_p3), %s662_s7, 4294967168  ;;  %p3856_p12 = scmp.eq.s32.totalorder %s3187_s17, 0 }
  0xe2   : > { %2968 = dma.done.wait (%p3856_p12), [#allocation7], 128   ;;  %p3857_p6 = pmov %p3856_p12 }
  0xe3   : > { %s676_s16 = sand.u32 1, %s2985_s22   ;;  %s675_s26 = scalar_lea.sflag [#allocation10], %s661_s21 }
  0xe4   : > { %2970 = vsyncadd (%p3857_p6), [#allocation7], 4294967168  ;;  %s3472_s5 = sshll.u32 %s676_s16, 4  ;;  %p3858_p0 = scmp.ne.s32.totalorder %s3824_s20, 0 }
  0xe6   : > { %2972 = dma.done.wait (%p3858_p0), %s675_s26, 272  }
  0xe7   : > { %2974 = vsyncadd (%p3858_p0), %s675_s26, 4294967024  ;;  %p784_p8 = scmp.lt.s32.totalorder %s3005_s27, 1  ;;  %s3860_s3 = sld [smem:[#allocation39_spill]] }
  0xe8   : > { %s3861_s21 = sld [smem:[#allocation40_spill]]  ;;  %s3862_s1 = sld [smem:[#allocation41_spill]] }
  0xe9   : > { %s3481_s19 = scalar_select %p784_p8, %s3005_s27, 1 }
  0xea   : > { %s3863_s25 = sld [smem:[#allocation43_spill]]  ;;  %s3864_s28 = sld [smem:[#allocation47_spill]] }
  0xeb   : > { %s2423_s17 = sshll.u32 %s3481_s19, 4  ;;  %s2426_s4 = sshll.u32 %s3481_s19, 5 }
  0xec   : > { %s3865_s22 = sld [smem:[#allocation46_spill]]  ;;  %s3866_s0 = sld [smem:[#allocation48_spill]] }
  0xed   : > { %s788_s18 = scalar_lea.vmem %s3860_s3, %s2423_s17  ;;  %s3867_s26 = sld [smem:[#allocation49_spill]] }
  0xee   : > { %s3494_s7 = scalar_lea.vmem %s3861_s21, %s2423_s17  ;;  %s3499_s11 = scalar_lea.vmem %s3862_s1, %s2423_s17 }
  0xef   : > { %s3523_s29 = scalar_lea.vmem [#allocation11], %s676_s16  ;;  %p2378_p10 = scmp.ne.s32.totalorder %s3005_s27, 0 }
  0xf0   : > { %s804_s23 = scalar_lea.vmem %s3863_s25, %s3481_s19  ;;  %s812_s13 = scalar_lea.vmem %s3864_s28, %s3481_s19  ;;  %v824_v0 = vld [vmem:[%s3453_s12] sm:$0xf] (!%p2378_p10)  ;;  %vm826_vm0 = vcmask (!%p2378_p10), 261120  }
  0xf1   : > { %s3525_s25 = scalar_lea.vmem [#allocation12], %s2366_s14  ;;  %823 = sbr.rel (%p2378_p10) target bundleno = 248 (0xf8), region = 108  ;;  %v825_v1 = vunpack.c.l.bf16 (!%p2378_p10), %v824_v0 }
  0xf2   : > { %s3513_s24 = scalar_lea.vmem %s3865_s22, %s2426_s4  ;;  %s815_s2 = scalar_lea.vmem %s3866_s0, %s3481_s19 }
  0xf3   : > { %s818_s8 = scalar_lea.vmem %s3867_s26, %s3481_s19  ;;  %827 = vst.msk [vmem:[%s3525_s25] sm:$0xff] (!%p2378_p10), %vm826_vm0, %v825_v1 }
  0xf8 PF: > { %v2707_v2 = vld [vmem:[%s788_s18] sm:$0xff]   ;;  %v3030_v3 = vmov 0.0   ;;  %v2708_v4 = vld [vmem:[%s788_s18 + $0x8] sm:$0xff]   ;;  %vm3031_vm1 = vmmov 0   ;;  %vm849_vm2 = vcmask 261120   ;;  %s3032_s22 = smov 32   ;;  %v1113_v33 = vlaneseq }
  0xf9   : > { %2464 = vmatprep.subr.bf16.mxu1 %v3030_v3  ;;  %2480 = vmatprep.subr.mxu0 %v3030_v3  ;;  %v831_v5 = vld [vmem:[#allocation8] sm:$0xff]  ;;  %v2710_v8 = vld [vmem:[%s3494_s7 + $0x8] sm:$0xff]   ;;  %s3868_s0 = sld [smem:[#allocation38_spill]]  ;;  %s3033_s12 = smov 96   ;;  %vm1120_vm3 = vcmask 64512   ;;  %v829_v38 = vld [vmem:[%s3461_s6] sm:$0xff] }
  0xfa   : > { %2465 = vmatpush3.bf16.msra.mxu1 %v2707_v2  ;;  %2468 = vmatprep.mubr.msk.bf16.mxu1 %vm3031_vm1, %v3030_v3  ;;  %v2709_v6 = vld [vmem:[%s3494_s7] sm:$0xff]   ;;  %v832_v7 = vpack.c.bf16 %v831_v5, %v831_v5  ;;  %v3544_v9 = vld [vmem:[%s3525_s25] sm:$0xff]  ;;  %s3034_s14 = smov 120   ;;  %s3035_s16 = smov 112   ;;  %v1114_v34 = vshrl.u32 %v1113_v33, 7  ;;  %vm830_vm4 = vcmp.gt.s32.totalorder %v829_v38, 0 }
  0xfb   : > { %2466 = vmatprep.subr.bf16.mxu1 %v3030_v3  ;;  %2482 = vmatprep.mubr.msk.f32.mxu0 %vm3031_vm1, %v3030_v3  ;;  %v893_v10 = vpack.c.bf16 %v3544_v9, %v3544_v9  ;;  %s3036_s28 = smov 104   ;;  %s3037_s18 = smov 88   ;;  %vm1460_vm5 = vcmask 130112   ;;  %vm1637_vm6 = vcmask 195712   ;;  %vm1814_vm7 = vcmask 261312  }
  0xfc   : > { %s3869_s10 = sld [smem:[#allocation37_spill]]  ;;  %s3038_s9 = smov 80   ;;  %v1115_v35 = vsub.s32 0, %v1114_v34  ;;  %v1287_v37 = vsub.s32 1, %v1114_v34  ;;  %v1464_v44 = vsub.s32 2, %v1114_v34  ;;  %v1641_v52 = vsub.s32 3, %v1114_v34 }
  0xfd   : > { %s3039_s20 = smov 72   ;;  %s3040_s6 = smov 56   ;;  %vm2016_vm8 = vcmask 523264  }
  0xfe   : > { %2467 = vmatpush3.bf16.msra.mxu1 %v2708_v4  ;;  %s3041_s3 = smov 64   ;;  %s3042_s15 = smov 48  }
  0xff   : > { %2472 = vmatprep.subr.bf16.mxu1 %v3030_v3  ;;  %v959_v14 = vld [vmem:[%s3868_s0] sm:$0xf]  ;;  %s3043_s21 = smov 40   ;;  %s3044_s1 = smov 8  }
 0x100   : > { %s3045_s17 = smov 16   ;;  %s3046_s26 = smov 24  }
 0x101   : > { %2469 = vmatmul.mubr.msk.bf16.vlgmr.msra.gmra.mrb[0].mxu1 %vm849_vm2, %v832_v7  ;;  %s3872_s30 = sld [smem:[#allocation42_spill]] }
 0x102   : > { %2473 = vmatpush3.bf16.msra.mxu1 %v2709_v6  ;;  %2476 = vmatprep.mubr.msk.bf16.mxu1 %vm3031_vm1, %v3030_v3  ;;  %v958_v23 = vld [vmem:[%s3869_s10] sm:$0xf] }
 0x103   : > { %2474 = vmatprep.subr.bf16.mxu1 %v3030_v3 }
 0x106   : > { %2475 = vmatpush3.bf16.msra.mxu1 %v2710_v8 }
 0x107   : > { %2490 = vmatprep.subr.mxu1 %v3030_v3  ;;  %s3873_s0 = scalar_lea.vmem %s3872_s30, %s3481_s19 }
 0x109   : > { %2477 = vmatmul.mubr.msk.bf16.vlgmr.msra.gmra.mrb[4].mxu1 %vm849_vm2, %v893_v10 }
 0x10a   : > { %2492 = vmatprep.mubr.msk.f32.mxu1 %vm3031_vm1, %v3030_v3 }
 0x1d4   : > { %v887_v11 = vpop.f32.mrb[0].mxu1 }
 0x1d5   : > { %954 = vrot.lane.b32.xlu0 %v887_v11, %s3032_s22  ;;  %v2470_v12 = vpop.f32.mrb[1].mxu1  ;;  %2481 = vmatpush3.xpose.msk.msra.mxu0 %vm849_vm2, %v887_v11 }
 0x1d6   : > { %v890_v13 = vpop.f32.mrb[2].mxu1  ;;  %2485 = vmatprep.subr.mxu0 %v3030_v3 }
 0x1d7   : > { %v2471_v15 = vpop.f32.mrb[3].mxu1 }
 0x1d8   : > { %2483 = vmatmul.mubr.msk.f32.vlgmr.msra.gmra.mrb[0].mxu0 %vm849_vm2, %v959_v14 }
 0x1d9   : > { %2487 = vmatprep.mubr.msk.f32.mxu0 %vm3031_vm1, %v3030_v3 }
 0x1dc   : > { %v3561_v16 = vpop.f32.mrb[4].mxu1 }
 0x1dd   : > { %1036 = vrot.lane.b32.xlu0 %v3561_v16, %s3033_s12  ;;  %v2478_v17 = vpop.f32.mrb[5].mxu1 }
 0x1de   : > { %v950_v18 = vpop.f32.mrb[6].mxu1 }
 0x1df   : > { %v2479_v19 = vpop.f32.mrb[7].mxu1 }
 0x1e1   : > { %1289 = vrot.lane.b32.xlu0 %v3561_v16, %s3034_s14 }
 0x1e5   : > { %1466 = vrot.lane.b32.xlu0 %v3561_v16, %s3035_s16 }
 0x1e9   : > { %1643 = vrot.lane.b32.xlu0 %v3561_v16, %s3036_s28 }
 0x247   : > { %v955_v20 = vpop.permute.xlu0 %954 }
 0x248   : > { %v957_v21 = vadd.f32 %v955_v20, %v3561_v16 }
 0x24a   : > { %1118 = vrot.lane.b32.xlu1 %v957_v21, %s3033_s12 }
 0x24e   : > { %1291 = vrot.lane.b32.xlu1 %v957_v21, %s3037_s18 }
 0x24f   : > { %v1037_v22 = vpop.permute.xlu0 %1036 }
 0x250   : > { %2486 = vmatpush3.xpose.msk.msra.mxu0 %vm849_vm2, %v1037_v22 }
 0x251   : > { %2500 = vmatprep.subr.mxu0 %v3030_v3 }
 0x252   : > { %1468 = vrot.lane.b32.xlu1 %v957_v21, %s3038_s9 }
 0x253   : > { %2488 = vmatmul.mubr.msk.f32.vlgmr.msra.gmra.mrb[0].mxu0 %vm849_vm2, %v958_v23  ;;  %v1290_v25 = vpop.permute.xlu0 %1289 }
 0x254   : > { %2502 = vmatprep.mubr.msk.f32.mxu0 %vm3031_vm1, %v3030_v3 }
 0x256   : > { %1645 = vrot.lane.b32.xlu1 %v957_v21, %s3039_s20 }
 0x257   : > { %v1467_v28 = vpop.permute.xlu0 %1466 }
 0x25b   : > { %v1644_v30 = vpop.permute.xlu0 %1643 }
 0x2bc   : > { %v1119_v24 = vpop.permute.xlu1 %1118 }
 0x2bd   : > { %2491 = vmatpush3.xpose.msk.msra.mxu1 %vm1120_vm3, %v1119_v24 }
 0x2be   : > { %2495 = vmatprep.subr.mxu1 %v3030_v3 }
 0x2c0   : > { %2493 = vmatmul.mubr.msk.f32.vlgmr.msra.gmra.mrb[8].mxu1 %vm1120_vm3, %v3561_v16  ;;  %v1292_v26 = vpop.permute.xlu1 %1291 }
 0x2c1   : > { %2501 = vmatpush3.xpose.msk.msra.mxu0 %vm1120_vm3, %v1292_v26  ;;  %2497 = vmatprep.mubr.msk.f32.mxu1 %vm3031_vm1, %v3030_v3 }
 0x2c2   : > { %2510 = vmatprep.subr.mxu0 %v3030_v3 }
 0x2c4   : > { %2503 = vmatmul.mubr.msk.f32.vlgmr.msra.gmra.mrb[2].mxu0 %vm1120_vm3, %v1290_v25  ;;  %v1469_v27 = vpop.permute.xlu1 %1468 }
 0x2c5   : > { %2511 = vmatpush3.xpose.msk.msra.mxu0 %vm1120_vm3, %v1469_v27  ;;  %2512 = vmatprep.mubr.msk.f32.mxu0 %vm3031_vm1, %v3030_v3 }
 0x2c6   : > { %2520 = vmatprep.subr.mxu0 %v3030_v3 }
 0x2c8   : > { %2513 = vmatmul.mubr.msk.f32.vlgmr.msra.gmra.mrb[4].mxu0 %vm1120_vm3, %v1467_v28  ;;  %v1646_v29 = vpop.permute.xlu1 %1645 }
 0x2c9   : > { %2521 = vmatpush3.xpose.msk.msra.mxu0 %vm1120_vm3, %v1646_v29  ;;  %2522 = vmatprep.mubr.msk.f32.mxu0 %vm3031_vm1, %v3030_v3 }
 0x2ca   : > { %2530 = vmatprep.subr.bf16.mxu0 %v3030_v3 }
 0x2cc   : > { %2523 = vmatmul.mubr.msk.f32.vlgmr.msra.gmra.mrb[6].mxu0 %vm1120_vm3, %v1644_v30 }
 0x2cd   : > { %2534 = vmatprep.mubr.msk.bf16.mxu0 %vm3031_vm1, %v3030_v3 }
 0x326   : > { %v1109_v31 = vpop.f32.mrb[0].mxu0 }
 0x327   : > { %v2489_v32 = vpop.f32.mrb[1].mxu0  ;;  %v1116_v36 = vrot.slane %v1109_v31, %v1115_v35  ;;  %v1288_v43 = vrot.slane %v1109_v31, %v1287_v37  ;;  %v1465_v51 = vrot.slane %v1109_v31, %v1464_v44  ;;  %v1642_v59 = vrot.slane %v1109_v31, %v1641_v52 }
 0x393   : > { %v1191_v39 = vpop.f32.mrb[8].mxu1 }
 0x394   : > { %v1192_v40 = vadd.f32 %v1191_v39, %v1116_v36  ;;  %v2494_v41 = vpop.f32.mrb[9].mxu1 }
 0x396   : > { %v1195_v42 = vmul.f32 0.35355338, %v1192_v40 }
 0x397   : > { %v1363_v45 = vpop.f32.mrb[2].mxu0 }
 0x398   : > { %v1364_v46 = vadd.f32 %v1363_v45, %v1288_v43  ;;  %v2504_v47 = vpop.f32.mrb[3].mxu0  ;;  %v1196_v48 = vsel %vm830_vm4, %v1195_v42, -1e+30 }
 0x399   : > { %v1197_v49 = vsel %vm1120_vm3, %v1196_v48, -inf  ;;  %v2712_v47 = vld [vmem:[%s3499_s11 + $0x8] sm:$0xff]  }
 0x39a   : > { %v1367_v50 = vmul.f32 0.35355338, %v1364_v46  ;;  %1198 = vmax.xlane.f32.xlu1 %v1197_v49  ;;  %v2711_v46 = vld [vmem:[%s3499_s11] sm:$0xff]   ;;  %s3870_s11 = scalar_lea.vmem [#allocation9], %s3472_s5 }
 0x39b   : > { %v1540_v53 = vpop.f32.mrb[4].mxu0  ;;  %2531 = vmatpush3.bf16.msra.mxu0 %v2711_v46  ;;  %s3871_s22 = smov %s3870_s11 }
 0x39c   : > { %v1541_v54 = vadd.f32 %v1540_v53, %v1465_v51  ;;  %v2514_v55 = vpop.f32.mrb[5].mxu0  ;;  %v1368_v56 = vsel %vm830_vm4, %v1367_v50, -1e+30  ;;  %2532 = vmatprep.subr.bf16.mxu0 %v3030_v3 }
 0x39d   : > { %v1369_v57 = vsel %vm1120_vm3, %v1368_v56, -inf }
 0x39e   : > { %v1544_v58 = vmul.f32 0.35355338, %v1541_v54  ;;  %1370 = vmax.xlane.f32.xlu0 %v1369_v57 }
 0x39f   : > { %v1717_v60 = vpop.f32.mrb[6].mxu0  ;;  %2533 = vmatpush3.bf16.msra.mxu0 %v2712_v47  ;;  %v2417_v47 = vld [vmem:[%s818_s8] ss:$0 sm:$0xff]  ;;  %s3047_s8 = smov [#allocation12]  }
 0x3a0   : > { %v1718_v61 = vadd.f32 %v1717_v60, %v1642_v59  ;;  %v2524_v62 = vpop.f32.mrb[7].mxu0  ;;  %v1545_v63 = vsel %vm830_vm4, %v1544_v58, -1e+30  ;;  %2546 = vmatprep.subr.bf16.mxu0 %v3030_v3  ;;  %s2891_s19 = sshll.u32 %s3047_s8, 4  ;;  %s2892_s19 = int_to_ptr.vmem [resolvable:$false] %s2891_s19 }
 0x3a1   : > { %v1546_v0 = vsel %vm1120_vm3, %v1545_v63, -inf }
 0x3a2   : > { %v1721_v1 = vmul.f32 0.35355338, %v1718_v61  ;;  %1547 = vmax.xlane.f32.xlu0 %v1546_v0 }
 0x3a4   : > { %v1722_v2 = vsel %vm830_vm4, %v1721_v1, -1e+30 }
 0x3a5   : > { %v1723_v4 = vsel %vm1120_vm3, %v1722_v2, -inf }
 0x3a6   : > { %1724 = vmax.xlane.f32.xlu1 %v1723_v4 }
 0x3b7   : > { %1380 = vrot.lane.b32.xlu1 %v3561_v16, %s3040_s6 }
 0x427   : > { %v1199_v5 = vpop.xlane.xlu1 %1198 }
 0x428   : > { %v1200_v6 = vsub.f32 %v1196_v48, %v1199_v5  ;;  %v2713_v5 = vld [vmem:[%s3870_s11] sm:$0xff]  }
 0x42a   : > { %v1201_v7 = vmul.f32 1.442695, %v1200_v6  ;;  %v2715_v6 = vld [vmem:[%s3513_s24] sm:$0xff]  }
 0x42b   : > { %v1371_v8 = vpop.xlane.xlu0 %1370 }
 0x42c   : > { %2719 = vpow2.f32 %v1201_v7  ;;  %v1372_v10 = vsub.f32 %v1368_v56, %v1371_v8  ;;  %v2716_v7 = vld [vmem:[%s3513_s24 + $0x8] sm:$0xff]  }
 0x42e   : > { %v1373_v11 = vmul.f32 1.442695, %v1372_v10 }
 0x42f   : > { %v1548_v22 = vpop.xlane.xlu0 %1547 }
 0x430   : > { %2721 = vpow2.f32 %v1373_v11  ;;  %v1549_v23 = vsub.f32 %v1545_v63, %v1548_v22  ;;  %v2406_v22 = vld [vmem:[%s3523_s29] ss:$0 sm:$0xff]  ;;  %s3878_s29 = sld [smem:[#allocation30_spill]] }
 0x432   : > { %v1550_v24 = vmul.f32 1.442695, %v1549_v23 }
 0x433   : > { %v1725_v12 = vpop.xlane.xlu1 %1724 }
 0x434   : > { %v1726_v13 = vsub.f32 %v1722_v2, %v1725_v12 }
 0x436   : > { %v2720_v14 = vpop.eup %2719  ;;  %v1727_v15 = vmul.f32 1.442695, %v1726_v13  ;;  %v2404_v13 = vld [vmem:[%s3873_s0] ss:$0 sm:$0xff]  ;;  %p3882_p13 = scmp.ne.s32.totalorder %s3878_s29, 0 }
 0x437   : > { %v1203_v17 = vsel %vm1120_vm3, %v2720_v14, 0.0  ;;  %v1381_v27 = vpop.permute.xlu1 %1380 }
 0x438   : > { %2723 = vpow2.f32 %v1727_v15  ;;  %1204 = vadd.xlane.f32.xlu0 %v1203_v17  ;;  %v2405_v15 = vld [vmem:[%s804_s23] ss:$0 sm:$0xff] }
 0x439   : > { %2725 = vpow2.f32 %v1550_v24 }
 0x43a   : > { %v2722_v18 = vpop.eup %2721 }
 0x43b   : > { %v1375_v19 = vsel %vm1120_vm3, %v2722_v18, 0.0 }
 0x43c   : > { %1376 = vadd.xlane.f32.xlu1 %v1375_v19 }
 0x442   : > { %v2724_v20 = vpop.eup %2723 }
 0x443   : > { %v1729_v21 = vsel %vm1120_vm3, %v2724_v20, 0.0  ;;  %v2726_v25 = vpop.eup %2725 }
 0x444   : > { %1730 = vadd.xlane.f32.xlu1 %v1729_v21  ;;  %v1552_v26 = vsel %vm1120_vm3, %v2726_v25, 0.0  ;;  %v2718_v21 = vld [vmem:[%s3513_s24 + $0x18] sm:$0xff]  }
 0x44e   : > { %1208 = vrot.lane.b32.xlu0 %v3561_v16, %s3041_s3 }
 0x455   : > { %1557 = vrot.lane.b32.xlu1 %v3561_v16, %s3042_s15  ;;  %s2105_s15 = sshll.u32 %s3525_s25, 4  ;;  %s3689_s15 = int_to_ptr.vmem [resolvable:$true] %s2105_s15 }
 0x456   : > { %s2887_s11 = scalar_lea.vmem %s3689_s15, 128  ;;  %p2894_p7 = scmp.lt.s32.totalorder %s3689_s15, %s2892_s19 }
 0x457   : > { %p2888_p1 = scmp.ne.s32.totalorder %s3689_s15, %s2887_s11 }
 0x459   : > { %p2889_p9 = pnand %p2888_p1, %p3882_p13 }
 0x45b   : > { %p2890_p4 = pneg %p2889_p9 }
 0x46d   : > { %1553 = vadd.xlane.f32.xlu0 %v1552_v26 }
 0x483   : > { %1734 = vrot.lane.b32.xlu0 %v3561_v16, %s3043_s21 }
 0x4c5   : > { %v1205_v28 = vpop.xlane.xlu0 %1204 }
 0x4c6   : > { %2727 = vrcp.f32 %v1205_v28 }
 0x4c9   : > { %v1209_v29 = vpop.permute.xlu0 %1208  ;;  %v1377_v30 = vpop.xlane.xlu1 %1376 }
 0x4ca   : > { %2729 = vrcp.f32 %v1377_v30  ;;  %2496 = vmatpush3.msra.mxu1 %v1209_v29  ;;  %v2410_v30 = vld [vmem:[%s812_s13] ss:$0 sm:$0xff]  ;;  %s3877_s13 = sld [smem:[#allocation33_spill]] }
 0x4cb   : > { %2505 = vmatprep.subr.mxu1 %v3030_v3 }
 0x4d0   : > { %v2728_v31 = vpop.eup %2727 }
 0x4d1   : > { %v1207_v32 = vmul.f32 %v2728_v31, %v2720_v14  ;;  %v1731_v33 = vpop.xlane.xlu1 %1730 }
 0x4d3   : > { %2498 = vmatmul.mubr.msk.f32.vlgmr.msra.gmra.mrb[10].mxu1 %vm1120_vm3, %v1207_v32 }
 0x4d4   : > { %v2730_v34 = vpop.eup %2729  ;;  %2506 = vmatpush3.msra.mxu1 %v1381_v27  ;;  %2507 = vmatprep.mubr.msk.f32.mxu1 %vm3031_vm1, %v3030_v3 }
 0x4d5   : > { %v1379_v16 = vmul.f32 %v2730_v34, %v2722_v18  ;;  %v1558_v35 = vpop.permute.xlu1 %1557  ;;  %2515 = vmatprep.subr.mxu1 %v3030_v3 }
 0x4d7   : > { %2508 = vmatmul.mubr.msk.f32.vlgmr.msra.gmra.mrb[12].mxu1 %vm1120_vm3, %v1379_v16 }
 0x4d8   : > { %2516 = vmatpush3.msra.mxu1 %v1558_v35  ;;  %2517 = vmatprep.mubr.msk.f32.mxu1 %vm3031_vm1, %v3030_v3 }
 0x4d9   : > { %2525 = vmatprep.subr.mxu1 %v3030_v3 }
 0x4fa   : > { %v1554_v36 = vpop.xlane.xlu0 %1553 }
 0x4fb   : > { %2731 = vrcp.f32 %v1554_v36 }
 0x4fc   : > { %2733 = vrcp.f32 %v1731_v33 }
 0x4fe   : > { %v1735_v40 = vpop.permute.xlu0 %1734 }
 0x505   : > { %v2732_v37 = vpop.eup %2731 }
 0x506   : > { %v1556_v38 = vmul.f32 %v2732_v37, %v2726_v25  ;;  %v2734_v39 = vpop.eup %2733 }
 0x507   : > { %v1733_v41 = vmul.f32 %v2734_v39, %v2724_v20  ;;  %v2717_v20 = vld [vmem:[%s3513_s24 + $0x10] sm:$0xff]   ;;  %s3876_s24 = sld [smem:[#allocation23_spill]] }
 0x508   : > { %2518 = vmatmul.mubr.msk.f32.vlgmr.msra.gmra.mrb[14].mxu1 %vm1120_vm3, %v1556_v38 }
 0x509   : > { %2526 = vmatpush3.msra.mxu1 %v1735_v40  ;;  %2527 = vmatprep.mubr.msk.f32.mxu1 %vm3031_vm1, %v3030_v3 }
 0x50a   : > { %2538 = vmatprep.subr.bf16.mxu1 %v3030_v3 }
 0x50c   : > { %2528 = vmatmul.mubr.msk.f32.vlgmr.msra.gmra.mrb[16].mxu1 %vm1120_vm3, %v1733_v41 }
 0x50d   : > { %2542 = vmatprep.mubr.msk.bf16.mxu1 %vm3031_vm1, %v3030_v3  ;;  %2539 = vmatpush3.bf16.msra.mxu1 %v2713_v5  ;;  %s2419_s3 = sshll.u32 %s3876_s24, 7 }
 0x50e   : > { %2540 = vmatprep.subr.bf16.mxu1 %v3030_v3 }
 0x5a6   : > { %v1280_v42 = vpop.f32.mrb[10].mxu1 }
 0x5a7   : > { %1284 = vst.msk [vmem:[#allocation2] sm:$0xff] %vm1120_vm3, %v1280_v42  ;;  %v2499_v43 = vpop.f32.mrb[11].mxu1 }
 0x5aa   : > { %v1452_v44 = vpop.f32.mrb[12].mxu1 }
 0x5ab   : > { %1457 = vrot.lane.b32.xlu1 %v1452_v44, %s3044_s1  ;;  %v2509_v45 = vpop.f32.mrb[13].mxu1 }
 0x5ac   : > { %v2416_v45 = vld [vmem:[%s815_s2] ss:$0 sm:$0xff]  ;;  %s2092_s2 = scalar_lea.sflag [#allocation5], %s3877_s13 }
 0x5db   : > { %v1629_v48 = vpop.f32.mrb[14].mxu1 }
 0x5dc   : > { %1634 = vrot.lane.b32.xlu0 %v1629_v48, %s3045_s17  ;;  %v2519_v49 = vpop.f32.mrb[15].mxu1  ;;  %s3881_s17 = sld [smem:[#allocation50_spill]] }
 0x5df   : > { %v1806_v50 = vpop.f32.mrb[16].mxu1 }
 0x5e0   : > { %1811 = vrot.lane.b32.xlu1 %v1806_v50, %s3046_s26  ;;  %v2529_v51 = vpop.f32.mrb[17].mxu1 }
 0x5e2   : > { %s3687_s26 = scalar_lea.hbm %s3881_s17, %s2419_s3 }
 0x61d   : > { %v1458_v52 = vpop.permute.xlu1 %1457 }
 0x61e   : > { %1461 = vst.msk [vmem:[#allocation2] sm:$0xff] %vm1460_vm5, %v1458_v52 }
 0x64e   : > { %v1635_v53 = vpop.permute.xlu0 %1634 }
 0x64f   : > { %1638 = vst.msk [vmem:[#allocation2] sm:$0xff] %vm1637_vm6, %v1635_v53 }
 0x652   : > { %v1812_v54 = vpop.permute.xlu1 %1811 }
 0x653   : > { %1815 = vst.msk [vmem:[#allocation2] sm:$0xff] %vm1814_vm7, %v1812_v54 }
 0x65a   : > { %v1816_v55 = vld [vmem:[#allocation2] sm:$0xff] }
 0x65b   : > { %v1817_v56 = vpack.c.bf16 %v1816_v55, %v1816_v55 }
 0x65d   : > { %2535 = vmatmul.mubr.msk.bf16.vlgmr.msra.gmra.mrb[8].mxu0 %vm849_vm2, %v1817_v56 }
 0x65e   : > { %2554 = vmatprep.mubr.msk.bf16.mxu0 %vm3031_vm1, %v3030_v3  ;;  %2547 = vmatpush3.bf16.msra.mxu0 %v2715_v6 }
 0x65f   : > { %2548 = vmatprep.subr.bf16.mxu0 %v3030_v3 }
 0x662   : > { %2549 = vmatpush3.bf16.msra.mxu0 %v2716_v7 }
 0x663   : > { %2550 = vmatprep.subr.bf16.mxu0 %v3030_v3 }
 0x666   : > { %2551 = vmatpush3.bf16.msra.mxu0 %v2717_v20 }
 0x667   : > { %2552 = vmatprep.subr.bf16.mxu0 %v3030_v3 }
 0x66a   : > { %2553 = vmatpush3.bf16.msra.mxu0 %v2718_v21 }
 0x730   : > { %v1871_v57 = vpop.f32.mrb[8].mxu0 }
 0x731   : > { %v1877_v58 = vadd.f32 %v1871_v57, %v3544_v9  ;;  %v2536_v59 = vpop.f32.mrb[9].mxu0  ;;  %v2714_v9 = vld [vmem:[%s3871_s22 + $0x8] sm:$0xff]   ;;  %s2893_s22 = scalar_lea.vmem %s2892_s19, 256 }
 0x732   : > { %v1874_v60 = vpop.f32.mrb[10].mxu0  ;;  %2541 = vmatpush3.bf16.msra.mxu1 %v2714_v9  ;;  %p2895_p5 = scmp.lt.s32.totalorder %s2893_s22, %s2887_s11 }
 0x733   : > { %v2537_v61 = vpop.f32.mrb[11].mxu0  ;;  %v1878_v62 = vsel %vm849_vm2, %v1877_v58, 0.0 }
 0x734   : > { %1879 = vadd.xlane.f32.xlu0 %v1878_v62  ;;  %p2896_p11 = por %p2895_p5, %p2894_p7 }
 0x736   : > { %p2897_p2 = pnand %p2896_p11, %p2890_p4 }
 0x7c1   : > { %v1880_v63 = vpop.xlane.xlu0 %1879 }
 0x7c2   : > { %v1882_v0 = vmul.f32 0.03125, %v1880_v63 }
 0x7c4   : > { %v1883_v1 = vsub.f32 %v1877_v58, %v1882_v0 }
 0x7c6   : > { %v1884_v2 = vmul.f32 %v1883_v1, %v1883_v1 }
 0x7c8   : > { %v1885_v4 = vsel %vm849_vm2, %v1884_v2, 0.0 }
 0x7c9   : > { %1886 = vadd.xlane.f32.xlu1 %v1885_v4 }
 0x856   : > { %v1887_v8 = vpop.xlane.xlu1 %1886 }
 0x857   : > { %v1888_v10 = vmul.f32 0.03125, %v1887_v8 }
 0x859   : > { %v1889_v11 = vadd.f32 1e-05, %v1888_v10 }
 0x85b   : > { %2735 = vrsqrt.f32 %v1889_v11 }
 0x865   : > { %v2736_v12 = vpop.eup %2735 }
 0x866   : > { %v1891_v14 = vmul.f32 %v2736_v12, %v1883_v1 }
 0x868   : > { %v1899_v17 = vmul.f32 %v2404_v13, %v1891_v14 }
 0x86a   : > { %v1907_v18 = vadd.f32 %v2405_v15, %v1899_v17 }
 0x86c   : > { %v1908_v19 = vpack.c.bf16 %v1907_v18, %v1907_v18 }
 0x86e   : > { %2543 = vmatmul.mubr.msk.bf16.vlgmr.msra.gmra.mrb[20].mxu1 %vm849_vm2, %v1908_v19 }
 0x941   : > { %v1969_v23 = vpop.f32.mrb[20].mxu1 }
 0x942   : > { %v1970_v24 = vadd.f32 %v2406_v22, %v1969_v23  ;;  %v2544_v25 = vpop.f32.mrb[21].mxu1 }
 0x943   : > { %v1972_v26 = vpop.f32.mrb[22].mxu1 }
 0x944   : > { %v1975_v27 = vmax.f32 %v1970_v24, 0.0  ;;  %v2545_v28 = vpop.f32.mrb[23].mxu1 }
 0x946   : > { %v1976_v29 = vpack.c.bf16 %v1975_v27, %v1975_v27 }
 0x948   : > { %2555 = vmatmul.mubr.msk.bf16.vlgmr.msra.gmra.mrb[12].mxu0 %vm2016_vm8, %v1976_v29 }
 0xa1b   : > { %v2054_v31 = vpop.f32.mrb[12].mxu0 }
 0xa1c   : > { %v2055_v32 = vadd.f32 %v2410_v30, %v2054_v31  ;;  %v2556_v3 = vpop.f32.mrb[13].mxu0 }
 0xa1d   : > { %v2057_v33 = vpop.f32.mrb[14].mxu0 }
 0xa1e   : > { %v2557_v34 = vpop.f32.mrb[15].mxu0  ;;  %v2060_v16 = vadd.f32 %v2055_v32, %v1907_v18 }
 0xa20   : > { %v2061_v35 = vsel %vm849_vm2, %v2060_v16, 0.0 }
 0xa21   : > { %2062 = vadd.xlane.f32.xlu0 %v2061_v35 }
 0xaae   : > { %v2063_v36 = vpop.xlane.xlu0 %2062 }
 0xaaf   : > { %v2064_v37 = vmul.f32 0.03125, %v2063_v36 }
 0xab1   : > { %v2065_v38 = vsub.f32 %v2060_v16, %v2064_v37 }
 0xab3   : > { %v2066_v39 = vmul.f32 %v2065_v38, %v2065_v38 }
 0xab5   : > { %v2067_v40 = vsel %vm849_vm2, %v2066_v39, 0.0 }
 0xab6   : > { %2068 = vadd.xlane.f32.xlu0 %v2067_v40 }
 0xb43   : > { %v2069_v41 = vpop.xlane.xlu0 %2068 }
 0xb44   : > { %v2070_v42 = vmul.f32 0.03125, %v2069_v41 }
 0xb46   : > { %v2071_v43 = vadd.f32 1e-05, %v2070_v42 }
 0xb48   : > { %2737 = vrsqrt.f32 %v2071_v43 }
 0xb52   : > { %v2738_v44 = vpop.eup %2737 }
 0xb53   : > { %v2073_v46 = vmul.f32 %v2738_v44, %v2065_v38 }
 0xb55   : > { %v2081_v48 = vmul.f32 %v2416_v45, %v2073_v46 }
 0xb57   : > { %v2089_v49 = vadd.f32 %v2417_v47, %v2081_v48 }
 0xb59   : > { %2090 = vst.msk [vmem:[%s3525_s25] sm:$0xff] %vm849_vm2, %v2089_v49 }
 0xb5a   : > { %2900 = shalt.err (!%p2897_p2)
}
 0xb5b   : > { %s2901_s25 = scalar_lea.hbm %s3687_s26, 128  ;;  %s2905_s30 = scalar_lea.hbm %s3881_s17, 256 }
 0xb5c   : > { %p2902_p3 = scmp.ne.s32.totalorder %s3687_s26, %s2901_s25  ;;  %p2906_p0 = scmp.lt.u32.totalorder %s3687_s26, %s3881_s17 }
 0xb5d   : > { %p2907_p8 = scmp.lt.u32.totalorder %s2905_s30, %s2901_s25  ;;  %p2909_p1 = scmp.lt.u32.totalorder %s2901_s25, %s3687_s26 }
 0xb5e   : > { %p2903_p12 = pnand %p2902_p3, %p3882_p13 }
 0xb5f   : > { %p2908_p10 = por %p2907_p8, %p2906_p0 }
 0xb60   : > { %p2904_p6 = pneg %p2903_p12 }
 0xb61   : > { %p2910_p9 = por %p2909_p1, %p2908_p10 }
 0xb63   : > { %p2911_p4 = pnand %p2910_p9, %p2904_p6 }
 0xb65   : > { %2914 = shalt.err (!%p2911_p4)
}
 0xb66   : > { %2572 = dma.vmem_to_hbm [thread:$0]  (%p3882_p13), %s3689_s15, 128, %s3687_s26, %s2092_s2  }
 0xb67 PF: > { %s3883_s14 = sld [smem:[#allocation26_spill]]  ;;  %s3884_s16 = sld [smem:[#allocation20_spill]] }
 0xb68   : > { %s3885_s23 = sld [smem:[#allocation27_spill]] }
 0xb6d   : > { %p2598_p7 = scmp.ge.s32.totalorder %s3883_s14, 2  ;;  %s2117_s28 = sand.u32 1, %s3884_s16  }
 0xb6e   : > { %p3886_p5 = scmp.ne.s32.totalorder %s3885_s23, 0  ;;  %s2118_s18 = scalar_lea.sflag [#allocation5], %s2117_s28 }
 0xb70   : > { %p2592_p11 = pnand %p2598_p7, %p3886_p5 }
 0xb72   : > { %2976 = dma.done.wait (!%p2592_p11), %s2118_s18, 128  }
 0xb73   : > { %2978 = vsyncadd (!%p2592_p11), %s2118_s18, 4294967168  ;;  %s38_s0 = sadd.s32 1, %s3883_s14   ;;  %s3887_s21 = sld [smem:[#allocation18_spill]] }
 0xb74   : > { %p35_p2 = scmp.ge.s32.totalorder %s38_s0, 6   ;;  %s3888_s22 = sld [smem:[#allocation19_spill]] }
 0xb75   : > { %s3889_s23 = sld [smem:[#allocation29_spill]]  ;;  %s3890_s24 = sld [smem:[#allocation21_spill]] }
 0xb76   : > { %s3891_s25 = sld [smem:[#allocation22_spill]]  ;;  %s3892_s26 = sld [smem:[#allocation32_spill]] }
 0xb77   : > { %s3893_s27 = sld [smem:[#allocation24_spill]]  ;;  %s3894_s28 = sld [smem:[#allocation25_spill]] }
 0xb78   : > { %s3895_s29 = sld [smem:[#allocation28_spill]]  ;;  %s3896_s30 = sld [smem:[#allocation31_spill]] }
 0xb79   :  { %37 = sbr.rel (!%p35_p2) target bundleno = 31 (0x1f), region = 201 }
 0xb80   :  { %2123 = vsyncpa [#allocation4], 1 }
 0xb81   :  { %2125 = vsyncpa [#allocation4 + $0x1], 1 }
 0xb82   :  { %2126 = vsyncpa [#allocation7], 1 }
 0xb83   :  { %2128 = vsyncpa [#allocation7 + $0x1], 1 }
 0xb84   :  { %2129 = vsyncpa [#allocation10], 1 }
 0xb85   :  { %2131 = vsyncpa [#allocation10 + $0x1], 1 }
 0xb86   :  { %2132 = vsyncpa [#allocation5], 1 }
 0xb87   :  { %2134 = vsyncpa [#allocation5 + $0x1], 1 }

</bundles_post_ra>
